<compile_context>
chip_gen: v7x
topology: tpu7x:2x2x1
jax: 0.10.0
libtpu: 0.0.40
codegen_flags: <defaults>
</compile_context>

<pallas_src>
import functools
import math

import jax
import jax.numpy as jnp
from jax import lax
from jax.experimental import pallas as pl
from jax.experimental.pallas import tpu as pltpu

INPUT_DIM = 2
HIDDEN_DIM = 8
OUTPUT_DIM = 1

SUB = 8       # sublanes per chunk (f32 vreg sublane depth)
LANE = 128    # lane quantum
MAX_LANE = 256  # lane width per chunk: 16 live (8, L) slabs ~= 32 vregs


def _round_up(x, m):
    return (x + m - 1) // m * m


def _cdiv(a, b):
    return (a + b - 1) // b


def _gelu_exact(x):
    # nn.GELU() default = exact erf formulation.
    return 0.5 * x * (1.0 + lax.erf(x * (1.0 / math.sqrt(2.0))))


def mlp_kernel(x_ref, w1_ref, b1_ref, w2_ref, b2_ref, w3_ref, b3_ref, o_ref,
               *, chunks_per_step):
    """One batch tile.

    x_ref : (INPUT_DIM, chunks_per_step*SUB, L) f32 VMEM — batch folded onto
            (sublane, lane); features on the leading axis.
    w*/b* : tiny parameter tables resident in SMEM, read as scalars.
    o_ref : (OUTPUT_DIM, chunks_per_step*SUB, L) f32 VMEM (lane-dense slab).
    """
    # Hoist all SMEM scalar reads out of the hot loop (loop invariant).
    w1 = [[w1_ref[k, j] for j in range(HIDDEN_DIM)] for k in range(INPUT_DIM)]
    b1 = [b1_ref[j] for j in range(HIDDEN_DIM)]
    w2 = [[w2_ref[k, j] for j in range(HIDDEN_DIM)] for k in range(HIDDEN_DIM)]
    b2 = [b2_ref[j] for j in range(HIDDEN_DIM)]
    w3 = [[w3_ref[k, j] for j in range(OUTPUT_DIM)] for k in range(HIDDEN_DIM)]
    b3 = [b3_ref[j] for j in range(OUTPUT_DIM)]

    def chunk_body(c):
        r0 = c * SUB
        if not isinstance(c, int):
            r0 = pl.multiple_of(r0, SUB)

        # Dense (SUB, L) activation slabs: all 8 sublanes carry data.
        xs = [x_ref[k, pl.ds(r0, SUB), :] for k in range(INPUT_DIM)]

        # fc1 + GELU : VPU broadcast-FMAs with scalar weights (no MXU).
        h1 = []
        for j in range(HIDDEN_DIM):
            acc = w1[0][j] * xs[0]
            for k in range(1, INPUT_DIM):
                acc = acc + w1[k][j] * xs[k]
            h1.append(_gelu_exact(acc + b1[j]))

        # fc2 + GELU
        h2 = []
        for j in range(HIDDEN_DIM):
            acc = w2[0][j] * h1[0]
            for k in range(1, HIDDEN_DIM):
                acc = acc + w2[k][j] * h1[k]
            h2.append(_gelu_exact(acc + b2[j]))

        # fc3
        for j in range(OUTPUT_DIM):
            acc = w3[0][j] * h2[0]
            for k in range(1, HIDDEN_DIM):
                acc = acc + w3[k][j] * h2[k]
            o_ref[j, pl.ds(r0, SUB), :] = acc + b3[j]

    if chunks_per_step == 1:
        chunk_body(0)
    else:
        # Short static trip count -> unrolled fori_loop (LLO visibility) while
        # keeping per-iteration live ranges bounded.
        lax.fori_loop(0, chunks_per_step, lambda c, carry: chunk_body(c),
                      None, unroll=True)


def mlp_forward(x, w1, b1, w2, b2, w3, b3, *, target_block_batch=32768):
    """x: (batch, INPUT_DIM) f32 -> (batch, OUTPUT_DIM) f32."""
    batch = x.shape[0]
    x = x.astype(jnp.float32)

    # Lane width per chunk (multiple of 128, shrunk for tiny batches).
    lane = min(MAX_LANE, _round_up(batch, LANE))
    chunk_elems = SUB * lane                     # batch elems per (8, lane) slab
    total_chunks = _cdiv(batch, chunk_elems)

    # Chunks per grid step: big enough to amortize the ~0.35us per-step
    # overhead, but keep >= 2 grid steps when there is enough work so v7x's
    # two TensorCores can split the ("parallel",) grid.
    cps = max(1, target_block_batch // chunk_elems)
    if total_chunks > 1:
        cps = min(cps, _cdiv(total_chunks, 2))
    cps = min(cps, total_chunks)

    grid_steps = _cdiv(total_chunks, cps)
    padded_chunks = grid_steps * cps
    padded = padded_chunks * chunk_elems
    rows = padded_chunks * SUB
    block_rows = cps * SUB

    # (batch, in) -> (in, batch): feature-major so the kernel sees dense
    # (sublane, lane) batch slabs.  The pad is required by the 3-D reshape;
    # garbage tail outputs are discarded by the [:batch] slice below.
    # (If the producer could emit x feature-major, this transpose — one extra
    # HBM pass over x — could be dropped; it is secondary for this VALU-bound
    # kernel.)
    x_t = jnp.transpose(x)
    if padded != batch:
        x_t = jnp.pad(x_t, ((0, 0), (0, padded - batch)))
    x_t = x_t.reshape(INPUT_DIM, rows, lane)

    smem = pl.BlockSpec(memory_space=pltpu.MemorySpace.SMEM)

    out_t = pl.pallas_call(
        functools.partial(mlp_kernel, chunks_per_step=cps),
        out_shape=jax.ShapeDtypeStruct((OUTPUT_DIM, rows, lane), jnp.float32),
        grid=(grid_steps,),
        in_specs=[
            pl.BlockSpec((INPUT_DIM, block_rows, lane), lambda i: (0, i, 0)),
            smem, smem, smem, smem, smem, smem,      # resident params
        ],
        out_specs=pl.BlockSpec((OUTPUT_DIM, block_rows, lane),
                               lambda i: (0, i, 0)),
        compiler_params=pltpu.CompilerParams(
            dimension_semantics=("parallel",)),
    )(x_t, w1, b1, w2, b2, w3, b3)

    # (1, rows, lane) -> (1, padded) is a free reshape; slice off the pad and
    # transpose (free for a (1, N) array) back to (batch, 1).
    out = out_t.reshape(OUTPUT_DIM, padded)[:, :batch]
    return jnp.transpose(out)


def init_linear_params(key, in_dim, out_dim):
    # Deterministic init mimicking PyTorch nn.Linear (uniform(-1/sqrt(in), 1/sqrt(in))).
    k_w, k_b = jax.random.split(key)
    bound = 1.0 / math.sqrt(in_dim)
    w = jax.random.uniform(k_w, (in_dim, out_dim), jnp.float32, -bound, bound)
    b = jax.random.uniform(k_b, (out_dim,), jnp.float32, -bound, bound)
    return w, b


def _reference(x, w1, b1, w2, b2, w3, b3):
    h = _gelu_exact(x @ w1 + b1)
    h = _gelu_exact(h @ w2 + b2)
    return h @ w3 + b3


if __name__ == "__main__":
    key = jax.random.PRNGKey(0)
    k_x, k_x2, k1, k2, k3 = jax.random.split(key, 5)

    w1, b1 = init_linear_params(k1, INPUT_DIM, HIDDEN_DIM)
    w2, b2 = init_linear_params(k2, HIDDEN_DIM, HIDDEN_DIM)
    w3, b3 = init_linear_params(k3, HIDDEN_DIM, OUTPUT_DIM)

    fwd = jax.jit(mlp_forward)

    # Small batch: single grid step, single (8, 128) chunk.
    batch = 8
    x = jax.random.normal(k_x, (batch, INPUT_DIM), jnp.float32)
    out = fwd(x, w1, b1, w2, b2, w3, b3)
    jax.block_until_ready(out)
    ref = _reference(x, w1, b1, w2, b2, w3, b3)
    assert out.shape == (batch, OUTPUT_DIM)
    assert jnp.allclose(out, ref, atol=1e-5, rtol=1e-5)

    # Larger batch: exercises multi-step grid (2 steps), the unrolled inner
    # chunk loop (5 chunks/step) and tail padding.
    batch2 = 20000
    x2 = jax.random.normal(k_x2, (batch2, INPUT_DIM), jnp.float32)
    out2 = fwd(x2, w1, b1, w2, b2, w3, b3)
    jax.block_until_ready(out2)
    ref2 = _reference(x2, w1, b1, w2, b2, w3, b3)
    assert out2.shape == (batch2, OUTPUT_DIM)
    assert jnp.allclose(out2, ref2, atol=1e-5, rtol=1e-5)

    print("KERNEL_OK")
</pallas_src>

<mosaic_0001>
module attributes {stable_mosaic.version = 11 : i64} {
  func.func @mlp_kernel(%arg0: i32, %arg1: memref<2x8x128xf32, #tpu.memory_space<vmem>>, %arg2: memref<2x8xf32, #tpu.memory_space<smem>>, %arg3: memref<8xf32, #tpu.memory_space<smem>>, %arg4: memref<8x8xf32, #tpu.memory_space<smem>>, %arg5: memref<8xf32, #tpu.memory_space<smem>>, %arg6: memref<8x1xf32, #tpu.memory_space<smem>>, %arg7: memref<1xf32, #tpu.memory_space<smem>>, %arg8: memref<1x8x128xf32, #tpu.memory_space<vmem>>) attributes {dimension_semantics = [#tpu.dimension_semantics<parallel>], iteration_bounds = array<i64: 1>, scalar_prefetch = 0 : i64, scratch_operands = 0 : i64, tpu.core_type = #tpu.core_type<tc>, window_params = [{transform_indices = @transform_0, window_bounds = array<i64: 2, 8, 128>}, {transform_indices = @transform_1, window_bounds = array<i64: 2, 8>}, {transform_indices = @transform_2, window_bounds = array<i64: 8>}, {transform_indices = @transform_3, window_bounds = array<i64: 8, 8>}, {transform_indices = @transform_4, window_bounds = array<i64: 8>}, {transform_indices = @transform_5, window_bounds = array<i64: 8, 1>}, {transform_indices = @transform_6, window_bounds = array<i64: 1>}, {transform_indices = @transform_7, window_bounds = array<i64: 1, 8, 128>}]} {
    %c0 = arith.constant 0 : index
    %c0_0 = arith.constant 0 : index
    %0 = memref.load %arg2[%c0, %c0_0] : memref<2x8xf32, #tpu.memory_space<smem>>
    %c0_1 = arith.constant 0 : index
    %c1 = arith.constant 1 : index
    %1 = memref.load %arg2[%c0_1, %c1] : memref<2x8xf32, #tpu.memory_space<smem>>
    %c0_2 = arith.constant 0 : index
    %c2 = arith.constant 2 : index
    %2 = memref.load %arg2[%c0_2, %c2] : memref<2x8xf32, #tpu.memory_space<smem>>
    %c0_3 = arith.constant 0 : index
    %c3 = arith.constant 3 : index
    %3 = memref.load %arg2[%c0_3, %c3] : memref<2x8xf32, #tpu.memory_space<smem>>
    %c0_4 = arith.constant 0 : index
    %c4 = arith.constant 4 : index
    %4 = memref.load %arg2[%c0_4, %c4] : memref<2x8xf32, #tpu.memory_space<smem>>
    %c0_5 = arith.constant 0 : index
    %c5 = arith.constant 5 : index
    %5 = memref.load %arg2[%c0_5, %c5] : memref<2x8xf32, #tpu.memory_space<smem>>
    %c0_6 = arith.constant 0 : index
    %c6 = arith.constant 6 : index
    %6 = memref.load %arg2[%c0_6, %c6] : memref<2x8xf32, #tpu.memory_space<smem>>
    %c0_7 = arith.constant 0 : index
    %c7 = arith.constant 7 : index
    %7 = memref.load %arg2[%c0_7, %c7] : memref<2x8xf32, #tpu.memory_space<smem>>
    %c1_8 = arith.constant 1 : index
    %c0_9 = arith.constant 0 : index
    %8 = memref.load %arg2[%c1_8, %c0_9] : memref<2x8xf32, #tpu.memory_space<smem>>
    %c1_10 = arith.constant 1 : index
    %c1_11 = arith.constant 1 : index
    %9 = memref.load %arg2[%c1_10, %c1_11] : memref<2x8xf32, #tpu.memory_space<smem>>
    %c1_12 = arith.constant 1 : index
    %c2_13 = arith.constant 2 : index
    %10 = memref.load %arg2[%c1_12, %c2_13] : memref<2x8xf32, #tpu.memory_space<smem>>
    %c1_14 = arith.constant 1 : index
    %c3_15 = arith.constant 3 : index
    %11 = memref.load %arg2[%c1_14, %c3_15] : memref<2x8xf32, #tpu.memory_space<smem>>
    %c1_16 = arith.constant 1 : index
    %c4_17 = arith.constant 4 : index
    %12 = memref.load %arg2[%c1_16, %c4_17] : memref<2x8xf32, #tpu.memory_space<smem>>
    %c1_18 = arith.constant 1 : index
    %c5_19 = arith.constant 5 : index
    %13 = memref.load %arg2[%c1_18, %c5_19] : memref<2x8xf32, #tpu.memory_space<smem>>
    %c1_20 = arith.constant 1 : index
    %c6_21 = arith.constant 6 : index
    %14 = memref.load %arg2[%c1_20, %c6_21] : memref<2x8xf32, #tpu.memory_space<smem>>
    %c1_22 = arith.constant 1 : index
    %c7_23 = arith.constant 7 : index
    %15 = memref.load %arg2[%c1_22, %c7_23] : memref<2x8xf32, #tpu.memory_space<smem>>
    %c0_24 = arith.constant 0 : index
    %16 = memref.load %arg3[%c0_24] : memref<8xf32, #tpu.memory_space<smem>>
    %c1_25 = arith.constant 1 : index
    %17 = memref.load %arg3[%c1_25] : memref<8xf32, #tpu.memory_space<smem>>
    %c2_26 = arith.constant 2 : index
    %18 = memref.load %arg3[%c2_26] : memref<8xf32, #tpu.memory_space<smem>>
    %c3_27 = arith.constant 3 : index
    %19 = memref.load %arg3[%c3_27] : memref<8xf32, #tpu.memory_space<smem>>
    %c4_28 = arith.constant 4 : index
    %20 = memref.load %arg3[%c4_28] : memref<8xf32, #tpu.memory_space<smem>>
    %c5_29 = arith.constant 5 : index
    %21 = memref.load %arg3[%c5_29] : memref<8xf32, #tpu.memory_space<smem>>
    %c6_30 = arith.constant 6 : index
    %22 = memref.load %arg3[%c6_30] : memref<8xf32, #tpu.memory_space<smem>>
    %c7_31 = arith.constant 7 : index
    %23 = memref.load %arg3[%c7_31] : memref<8xf32, #tpu.memory_space<smem>>
    %c0_32 = arith.constant 0 : index
    %c0_33 = arith.constant 0 : index
    %24 = memref.load %arg4[%c0_32, %c0_33] : memref<8x8xf32, #tpu.memory_space<smem>>
    %c0_34 = arith.constant 0 : index
    %c1_35 = arith.constant 1 : index
    %25 = memref.load %arg4[%c0_34, %c1_35] : memref<8x8xf32, #tpu.memory_space<smem>>
    %c0_36 = arith.constant 0 : index
    %c2_37 = arith.constant 2 : index
    %26 = memref.load %arg4[%c0_36, %c2_37] : memref<8x8xf32, #tpu.memory_space<smem>>
    %c0_38 = arith.constant 0 : index
    %c3_39 = arith.constant 3 : index
    %27 = memref.load %arg4[%c0_38, %c3_39] : memref<8x8xf32, #tpu.memory_space<smem>>
    %c0_40 = arith.constant 0 : index
    %c4_41 = arith.constant 4 : index
    %28 = memref.load %arg4[%c0_40, %c4_41] : memref<8x8xf32, #tpu.memory_space<smem>>
    %c0_42 = arith.constant 0 : index
    %c5_43 = arith.constant 5 : index
    %29 = memref.load %arg4[%c0_42, %c5_43] : memref<8x8xf32, #tpu.memory_space<smem>>
    %c0_44 = arith.constant 0 : index
    %c6_45 = arith.constant 6 : index
    %30 = memref.load %arg4[%c0_44, %c6_45] : memref<8x8xf32, #tpu.memory_space<smem>>
    %c0_46 = arith.constant 0 : index
    %c7_47 = arith.constant 7 : index
    %31 = memref.load %arg4[%c0_46, %c7_47] : memref<8x8xf32, #tpu.memory_space<smem>>
    %c1_48 = arith.constant 1 : index
    %c0_49 = arith.constant 0 : index
    %32 = memref.load %arg4[%c1_48, %c0_49] : memref<8x8xf32, #tpu.memory_space<smem>>
    %c1_50 = arith.constant 1 : index
    %c1_51 = arith.constant 1 : index
    %33 = memref.load %arg4[%c1_50, %c1_51] : memref<8x8xf32, #tpu.memory_space<smem>>
    %c1_52 = arith.constant 1 : index
    %c2_53 = arith.constant 2 : index
    %34 = memref.load %arg4[%c1_52, %c2_53] : memref<8x8xf32, #tpu.memory_space<smem>>
    %c1_54 = arith.constant 1 : index
    %c3_55 = arith.constant 3 : index
    %35 = memref.load %arg4[%c1_54, %c3_55] : memref<8x8xf32, #tpu.memory_space<smem>>
    %c1_56 = arith.constant 1 : index
    %c4_57 = arith.constant 4 : index
    %36 = memref.load %arg4[%c1_56, %c4_57] : memref<8x8xf32, #tpu.memory_space<smem>>
    %c1_58 = arith.constant 1 : index
    %c5_59 = arith.constant 5 : index
    %37 = memref.load %arg4[%c1_58, %c5_59] : memref<8x8xf32, #tpu.memory_space<smem>>
    %c1_60 = arith.constant 1 : index
    %c6_61 = arith.constant 6 : index
    %38 = memref.load %arg4[%c1_60, %c6_61] : memref<8x8xf32, #tpu.memory_space<smem>>
    %c1_62 = arith.constant 1 : index
    %c7_63 = arith.constant 7 : index
    %39 = memref.load %arg4[%c1_62, %c7_63] : memref<8x8xf32, #tpu.memory_space<smem>>
    %c2_64 = arith.constant 2 : index
    %c0_65 = arith.constant 0 : index
    %40 = memref.load %arg4[%c2_64, %c0_65] : memref<8x8xf32, #tpu.memory_space<smem>>
    %c2_66 = arith.constant 2 : index
    %c1_67 = arith.constant 1 : index
    %41 = memref.load %arg4[%c2_66, %c1_67] : memref<8x8xf32, #tpu.memory_space<smem>>
    %c2_68 = arith.constant 2 : index
    %c2_69 = arith.constant 2 : index
    %42 = memref.load %arg4[%c2_68, %c2_69] : memref<8x8xf32, #tpu.memory_space<smem>>
    %c2_70 = arith.constant 2 : index
    %c3_71 = arith.constant 3 : index
    %43 = memref.load %arg4[%c2_70, %c3_71] : memref<8x8xf32, #tpu.memory_space<smem>>
    %c2_72 = arith.constant 2 : index
    %c4_73 = arith.constant 4 : index
    %44 = memref.load %arg4[%c2_72, %c4_73] : memref<8x8xf32, #tpu.memory_space<smem>>
    %c2_74 = arith.constant 2 : index
    %c5_75 = arith.constant 5 : index
    %45 = memref.load %arg4[%c2_74, %c5_75] : memref<8x8xf32, #tpu.memory_space<smem>>
    %c2_76 = arith.constant 2 : index
    %c6_77 = arith.constant 6 : index
    %46 = memref.load %arg4[%c2_76, %c6_77] : memref<8x8xf32, #tpu.memory_space<smem>>
    %c2_78 = arith.constant 2 : index
    %c7_79 = arith.constant 7 : index
    %47 = memref.load %arg4[%c2_78, %c7_79] : memref<8x8xf32, #tpu.memory_space<smem>>
    %c3_80 = arith.constant 3 : index
    %c0_81 = arith.constant 0 : index
    %48 = memref.load %arg4[%c3_80, %c0_81] : memref<8x8xf32, #tpu.memory_space<smem>>
    %c3_82 = arith.constant 3 : index
    %c1_83 = arith.constant 1 : index
    %49 = memref.load %arg4[%c3_82, %c1_83] : memref<8x8xf32, #tpu.memory_space<smem>>
    %c3_84 = arith.constant 3 : index
    %c2_85 = arith.constant 2 : index
    %50 = memref.load %arg4[%c3_84, %c2_85] : memref<8x8xf32, #tpu.memory_space<smem>>
    %c3_86 = arith.constant 3 : index
    %c3_87 = arith.constant 3 : index
    %51 = memref.load %arg4[%c3_86, %c3_87] : memref<8x8xf32, #tpu.memory_space<smem>>
    %c3_88 = arith.constant 3 : index
    %c4_89 = arith.constant 4 : index
    %52 = memref.load %arg4[%c3_88, %c4_89] : memref<8x8xf32, #tpu.memory_space<smem>>
    %c3_90 = arith.constant 3 : index
    %c5_91 = arith.constant 5 : index
    %53 = memref.load %arg4[%c3_90, %c5_91] : memref<8x8xf32, #tpu.memory_space<smem>>
    %c3_92 = arith.constant 3 : index
    %c6_93 = arith.constant 6 : index
    %54 = memref.load %arg4[%c3_92, %c6_93] : memref<8x8xf32, #tpu.memory_space<smem>>
    %c3_94 = arith.constant 3 : index
    %c7_95 = arith.constant 7 : index
    %55 = memref.load %arg4[%c3_94, %c7_95] : memref<8x8xf32, #tpu.memory_space<smem>>
    %c4_96 = arith.constant 4 : index
    %c0_97 = arith.constant 0 : index
    %56 = memref.load %arg4[%c4_96, %c0_97] : memref<8x8xf32, #tpu.memory_space<smem>>
    %c4_98 = arith.constant 4 : index
    %c1_99 = arith.constant 1 : index
    %57 = memref.load %arg4[%c4_98, %c1_99] : memref<8x8xf32, #tpu.memory_space<smem>>
    %c4_100 = arith.constant 4 : index
    %c2_101 = arith.constant 2 : index
    %58 = memref.load %arg4[%c4_100, %c2_101] : memref<8x8xf32, #tpu.memory_space<smem>>
    %c4_102 = arith.constant 4 : index
    %c3_103 = arith.constant 3 : index
    %59 = memref.load %arg4[%c4_102, %c3_103] : memref<8x8xf32, #tpu.memory_space<smem>>
    %c4_104 = arith.constant 4 : index
    %c4_105 = arith.constant 4 : index
    %60 = memref.load %arg4[%c4_104, %c4_105] : memref<8x8xf32, #tpu.memory_space<smem>>
    %c4_106 = arith.constant 4 : index
    %c5_107 = arith.constant 5 : index
    %61 = memref.load %arg4[%c4_106, %c5_107] : memref<8x8xf32, #tpu.memory_space<smem>>
    %c4_108 = arith.constant 4 : index
    %c6_109 = arith.constant 6 : index
    %62 = memref.load %arg4[%c4_108, %c6_109] : memref<8x8xf32, #tpu.memory_space<smem>>
    %c4_110 = arith.constant 4 : index
    %c7_111 = arith.constant 7 : index
    %63 = memref.load %arg4[%c4_110, %c7_111] : memref<8x8xf32, #tpu.memory_space<smem>>
    %c5_112 = arith.constant 5 : index
    %c0_113 = arith.constant 0 : index
    %64 = memref.load %arg4[%c5_112, %c0_113] : memref<8x8xf32, #tpu.memory_space<smem>>
    %c5_114 = arith.constant 5 : index
    %c1_115 = arith.constant 1 : index
    %65 = memref.load %arg4[%c5_114, %c1_115] : memref<8x8xf32, #tpu.memory_space<smem>>
    %c5_116 = arith.constant 5 : index
    %c2_117 = arith.constant 2 : index
    %66 = memref.load %arg4[%c5_116, %c2_117] : memref<8x8xf32, #tpu.memory_space<smem>>
    %c5_118 = arith.constant 5 : index
    %c3_119 = arith.constant 3 : index
    %67 = memref.load %arg4[%c5_118, %c3_119] : memref<8x8xf32, #tpu.memory_space<smem>>
    %c5_120 = arith.constant 5 : index
    %c4_121 = arith.constant 4 : index
    %68 = memref.load %arg4[%c5_120, %c4_121] : memref<8x8xf32, #tpu.memory_space<smem>>
    %c5_122 = arith.constant 5 : index
    %c5_123 = arith.constant 5 : index
    %69 = memref.load %arg4[%c5_122, %c5_123] : memref<8x8xf32, #tpu.memory_space<smem>>
    %c5_124 = arith.constant 5 : index
    %c6_125 = arith.constant 6 : index
    %70 = memref.load %arg4[%c5_124, %c6_125] : memref<8x8xf32, #tpu.memory_space<smem>>
    %c5_126 = arith.constant 5 : index
    %c7_127 = arith.constant 7 : index
    %71 = memref.load %arg4[%c5_126, %c7_127] : memref<8x8xf32, #tpu.memory_space<smem>>
    %c6_128 = arith.constant 6 : index
    %c0_129 = arith.constant 0 : index
    %72 = memref.load %arg4[%c6_128, %c0_129] : memref<8x8xf32, #tpu.memory_space<smem>>
    %c6_130 = arith.constant 6 : index
    %c1_131 = arith.constant 1 : index
    %73 = memref.load %arg4[%c6_130, %c1_131] : memref<8x8xf32, #tpu.memory_space<smem>>
    %c6_132 = arith.constant 6 : index
    %c2_133 = arith.constant 2 : index
    %74 = memref.load %arg4[%c6_132, %c2_133] : memref<8x8xf32, #tpu.memory_space<smem>>
    %c6_134 = arith.constant 6 : index
    %c3_135 = arith.constant 3 : index
    %75 = memref.load %arg4[%c6_134, %c3_135] : memref<8x8xf32, #tpu.memory_space<smem>>
    %c6_136 = arith.constant 6 : index
    %c4_137 = arith.constant 4 : index
    %76 = memref.load %arg4[%c6_136, %c4_137] : memref<8x8xf32, #tpu.memory_space<smem>>
    %c6_138 = arith.constant 6 : index
    %c5_139 = arith.constant 5 : index
    %77 = memref.load %arg4[%c6_138, %c5_139] : memref<8x8xf32, #tpu.memory_space<smem>>
    %c6_140 = arith.constant 6 : index
    %c6_141 = arith.constant 6 : index
    %78 = memref.load %arg4[%c6_140, %c6_141] : memref<8x8xf32, #tpu.memory_space<smem>>
    %c6_142 = arith.constant 6 : index
    %c7_143 = arith.constant 7 : index
    %79 = memref.load %arg4[%c6_142, %c7_143] : memref<8x8xf32, #tpu.memory_space<smem>>
    %c7_144 = arith.constant 7 : index
    %c0_145 = arith.constant 0 : index
    %80 = memref.load %arg4[%c7_144, %c0_145] : memref<8x8xf32, #tpu.memory_space<smem>>
    %c7_146 = arith.constant 7 : index
    %c1_147 = arith.constant 1 : index
    %81 = memref.load %arg4[%c7_146, %c1_147] : memref<8x8xf32, #tpu.memory_space<smem>>
    %c7_148 = arith.constant 7 : index
    %c2_149 = arith.constant 2 : index
    %82 = memref.load %arg4[%c7_148, %c2_149] : memref<8x8xf32, #tpu.memory_space<smem>>
    %c7_150 = arith.constant 7 : index
    %c3_151 = arith.constant 3 : index
    %83 = memref.load %arg4[%c7_150, %c3_151] : memref<8x8xf32, #tpu.memory_space<smem>>
    %c7_152 = arith.constant 7 : index
    %c4_153 = arith.constant 4 : index
    %84 = memref.load %arg4[%c7_152, %c4_153] : memref<8x8xf32, #tpu.memory_space<smem>>
    %c7_154 = arith.constant 7 : index
    %c5_155 = arith.constant 5 : index
    %85 = memref.load %arg4[%c7_154, %c5_155] : memref<8x8xf32, #tpu.memory_space<smem>>
    %c7_156 = arith.constant 7 : index
    %c6_157 = arith.constant 6 : index
    %86 = memref.load %arg4[%c7_156, %c6_157] : memref<8x8xf32, #tpu.memory_space<smem>>
    %c7_158 = arith.constant 7 : index
    %c7_159 = arith.constant 7 : index
    %87 = memref.load %arg4[%c7_158, %c7_159] : memref<8x8xf32, #tpu.memory_space<smem>>
    %c0_160 = arith.constant 0 : index
    %88 = memref.load %arg5[%c0_160] : memref<8xf32, #tpu.memory_space<smem>>
    %c1_161 = arith.constant 1 : index
    %89 = memref.load %arg5[%c1_161] : memref<8xf32, #tpu.memory_space<smem>>
    %c2_162 = arith.constant 2 : index
    %90 = memref.load %arg5[%c2_162] : memref<8xf32, #tpu.memory_space<smem>>
    %c3_163 = arith.constant 3 : index
    %91 = memref.load %arg5[%c3_163] : memref<8xf32, #tpu.memory_space<smem>>
    %c4_164 = arith.constant 4 : index
    %92 = memref.load %arg5[%c4_164] : memref<8xf32, #tpu.memory_space<smem>>
    %c5_165 = arith.constant 5 : index
    %93 = memref.load %arg5[%c5_165] : memref<8xf32, #tpu.memory_space<smem>>
    %c6_166 = arith.constant 6 : index
    %94 = memref.load %arg5[%c6_166] : memref<8xf32, #tpu.memory_space<smem>>
    %c7_167 = arith.constant 7 : index
    %95 = memref.load %arg5[%c7_167] : memref<8xf32, #tpu.memory_space<smem>>
    %c0_168 = arith.constant 0 : index
    %c0_169 = arith.constant 0 : index
    %96 = memref.load %arg6[%c0_168, %c0_169] : memref<8x1xf32, #tpu.memory_space<smem>>
    %c1_170 = arith.constant 1 : index
    %c0_171 = arith.constant 0 : index
    %97 = memref.load %arg6[%c1_170, %c0_171] : memref<8x1xf32, #tpu.memory_space<smem>>
    %c2_172 = arith.constant 2 : index
    %c0_173 = arith.constant 0 : index
    %98 = memref.load %arg6[%c2_172, %c0_173] : memref<8x1xf32, #tpu.memory_space<smem>>
    %c3_174 = arith.constant 3 : index
    %c0_175 = arith.constant 0 : index
    %99 = memref.load %arg6[%c3_174, %c0_175] : memref<8x1xf32, #tpu.memory_space<smem>>
    %c4_176 = arith.constant 4 : index
    %c0_177 = arith.constant 0 : index
    %100 = memref.load %arg6[%c4_176, %c0_177] : memref<8x1xf32, #tpu.memory_space<smem>>
    %c5_178 = arith.constant 5 : index
    %c0_179 = arith.constant 0 : index
    %101 = memref.load %arg6[%c5_178, %c0_179] : memref<8x1xf32, #tpu.memory_space<smem>>
    %c6_180 = arith.constant 6 : index
    %c0_181 = arith.constant 0 : index
    %102 = memref.load %arg6[%c6_180, %c0_181] : memref<8x1xf32, #tpu.memory_space<smem>>
    %c7_182 = arith.constant 7 : index
    %c0_183 = arith.constant 0 : index
    %103 = memref.load %arg6[%c7_182, %c0_183] : memref<8x1xf32, #tpu.memory_space<smem>>
    %c0_184 = arith.constant 0 : index
    %104 = memref.load %arg7[%c0_184] : memref<1xf32, #tpu.memory_space<smem>>
    %c0_185 = arith.constant 0 : index
    %c0_186 = arith.constant 0 : index
    %c0_187 = arith.constant 0 : index
    %105 = vector.load %arg1[%c0_185, %c0_186, %c0_187] : memref<2x8x128xf32, #tpu.memory_space<vmem>>, vector<1x8x128xf32>
    %106 = vector.shape_cast %105 : vector<1x8x128xf32> to vector<8x128xf32>
    %c1_188 = arith.constant 1 : index
    %c0_189 = arith.constant 0 : index
    %c0_190 = arith.constant 0 : index
    %107 = vector.load %arg1[%c1_188, %c0_189, %c0_190] : memref<2x8x128xf32, #tpu.memory_space<vmem>>, vector<1x8x128xf32>
    %108 = vector.shape_cast %107 : vector<1x8x128xf32> to vector<8x128xf32>
    %109 = vector.broadcast %0 : f32 to vector<8x128xf32>
    %110 = arith.mulf %109, %106 : vector<8x128xf32>
    %111 = vector.broadcast %8 : f32 to vector<8x128xf32>
    %112 = arith.mulf %111, %108 : vector<8x128xf32>
    %113 = arith.addf %110, %112 : vector<8x128xf32>
    %114 = vector.broadcast %16 : f32 to vector<8x128xf32>
    %115 = arith.addf %113, %114 : vector<8x128xf32>
    %cst = arith.constant 5.000000e-01 : f32
    %116 = vector.broadcast %cst : f32 to vector<8x128xf32>
    %117 = arith.mulf %116, %115 : vector<8x128xf32>
    %cst_191 = arith.constant 0.707106769 : f32
    %118 = vector.broadcast %cst_191 : f32 to vector<8x128xf32>
    %119 = arith.mulf %115, %118 : vector<8x128xf32>
    %120 = math.erf %119 : vector<8x128xf32>
    %cst_192 = arith.constant 1.000000e+00 : f32
    %121 = vector.broadcast %cst_192 : f32 to vector<8x128xf32>
    %122 = arith.addf %121, %120 : vector<8x128xf32>
    %123 = arith.mulf %117, %122 : vector<8x128xf32>
    %124 = vector.broadcast %1 : f32 to vector<8x128xf32>
    %125 = arith.mulf %124, %106 : vector<8x128xf32>
    %126 = vector.broadcast %9 : f32 to vector<8x128xf32>
    %127 = arith.mulf %126, %108 : vector<8x128xf32>
    %128 = arith.addf %125, %127 : vector<8x128xf32>
    %129 = vector.broadcast %17 : f32 to vector<8x128xf32>
    %130 = arith.addf %128, %129 : vector<8x128xf32>
    %cst_193 = arith.constant 5.000000e-01 : f32
    %131 = vector.broadcast %cst_193 : f32 to vector<8x128xf32>
    %132 = arith.mulf %131, %130 : vector<8x128xf32>
    %cst_194 = arith.constant 0.707106769 : f32
    %133 = vector.broadcast %cst_194 : f32 to vector<8x128xf32>
    %134 = arith.mulf %130, %133 : vector<8x128xf32>
    %135 = math.erf %134 : vector<8x128xf32>
    %cst_195 = arith.constant 1.000000e+00 : f32
    %136 = vector.broadcast %cst_195 : f32 to vector<8x128xf32>
    %137 = arith.addf %136, %135 : vector<8x128xf32>
    %138 = arith.mulf %132, %137 : vector<8x128xf32>
    %139 = vector.broadcast %2 : f32 to vector<8x128xf32>
    %140 = arith.mulf %139, %106 : vector<8x128xf32>
    %141 = vector.broadcast %10 : f32 to vector<8x128xf32>
    %142 = arith.mulf %141, %108 : vector<8x128xf32>
    %143 = arith.addf %140, %142 : vector<8x128xf32>
    %144 = vector.broadcast %18 : f32 to vector<8x128xf32>
    %145 = arith.addf %143, %144 : vector<8x128xf32>
    %cst_196 = arith.constant 5.000000e-01 : f32
    %146 = vector.broadcast %cst_196 : f32 to vector<8x128xf32>
    %147 = arith.mulf %146, %145 : vector<8x128xf32>
    %cst_197 = arith.constant 0.707106769 : f32
    %148 = vector.broadcast %cst_197 : f32 to vector<8x128xf32>
    %149 = arith.mulf %145, %148 : vector<8x128xf32>
    %150 = math.erf %149 : vector<8x128xf32>
    %cst_198 = arith.constant 1.000000e+00 : f32
    %151 = vector.broadcast %cst_198 : f32 to vector<8x128xf32>
    %152 = arith.addf %151, %150 : vector<8x128xf32>
    %153 = arith.mulf %147, %152 : vector<8x128xf32>
    %154 = vector.broadcast %3 : f32 to vector<8x128xf32>
    %155 = arith.mulf %154, %106 : vector<8x128xf32>
    %156 = vector.broadcast %11 : f32 to vector<8x128xf32>
    %157 = arith.mulf %156, %108 : vector<8x128xf32>
    %158 = arith.addf %155, %157 : vector<8x128xf32>
    %159 = vector.broadcast %19 : f32 to vector<8x128xf32>
    %160 = arith.addf %158, %159 : vector<8x128xf32>
    %cst_199 = arith.constant 5.000000e-01 : f32
    %161 = vector.broadcast %cst_199 : f32 to vector<8x128xf32>
    %162 = arith.mulf %161, %160 : vector<8x128xf32>
    %cst_200 = arith.constant 0.707106769 : f32
    %163 = vector.broadcast %cst_200 : f32 to vector<8x128xf32>
    %164 = arith.mulf %160, %163 : vector<8x128xf32>
    %165 = math.erf %164 : vector<8x128xf32>
    %cst_201 = arith.constant 1.000000e+00 : f32
    %166 = vector.broadcast %cst_201 : f32 to vector<8x128xf32>
    %167 = arith.addf %166, %165 : vector<8x128xf32>
    %168 = arith.mulf %162, %167 : vector<8x128xf32>
    %169 = vector.broadcast %4 : f32 to vector<8x128xf32>
    %170 = arith.mulf %169, %106 : vector<8x128xf32>
    %171 = vector.broadcast %12 : f32 to vector<8x128xf32>
    %172 = arith.mulf %171, %108 : vector<8x128xf32>
    %173 = arith.addf %170, %172 : vector<8x128xf32>
    %174 = vector.broadcast %20 : f32 to vector<8x128xf32>
    %175 = arith.addf %173, %174 : vector<8x128xf32>
    %cst_202 = arith.constant 5.000000e-01 : f32
    %176 = vector.broadcast %cst_202 : f32 to vector<8x128xf32>
    %177 = arith.mulf %176, %175 : vector<8x128xf32>
    %cst_203 = arith.constant 0.707106769 : f32
    %178 = vector.broadcast %cst_203 : f32 to vector<8x128xf32>
    %179 = arith.mulf %175, %178 : vector<8x128xf32>
    %180 = math.erf %179 : vector<8x128xf32>
    %cst_204 = arith.constant 1.000000e+00 : f32
    %181 = vector.broadcast %cst_204 : f32 to vector<8x128xf32>
    %182 = arith.addf %181, %180 : vector<8x128xf32>
    %183 = arith.mulf %177, %182 : vector<8x128xf32>
    %184 = vector.broadcast %5 : f32 to vector<8x128xf32>
    %185 = arith.mulf %184, %106 : vector<8x128xf32>
    %186 = vector.broadcast %13 : f32 to vector<8x128xf32>
    %187 = arith.mulf %186, %108 : vector<8x128xf32>
    %188 = arith.addf %185, %187 : vector<8x128xf32>
    %189 = vector.broadcast %21 : f32 to vector<8x128xf32>
    %190 = arith.addf %188, %189 : vector<8x128xf32>
    %cst_205 = arith.constant 5.000000e-01 : f32
    %191 = vector.broadcast %cst_205 : f32 to vector<8x128xf32>
    %192 = arith.mulf %191, %190 : vector<8x128xf32>
    %cst_206 = arith.constant 0.707106769 : f32
    %193 = vector.broadcast %cst_206 : f32 to vector<8x128xf32>
    %194 = arith.mulf %190, %193 : vector<8x128xf32>
    %195 = math.erf %194 : vector<8x128xf32>
    %cst_207 = arith.constant 1.000000e+00 : f32
    %196 = vector.broadcast %cst_207 : f32 to vector<8x128xf32>
    %197 = arith.addf %196, %195 : vector<8x128xf32>
    %198 = arith.mulf %192, %197 : vector<8x128xf32>
    %199 = vector.broadcast %6 : f32 to vector<8x128xf32>
    %200 = arith.mulf %199, %106 : vector<8x128xf32>
    %201 = vector.broadcast %14 : f32 to vector<8x128xf32>
    %202 = arith.mulf %201, %108 : vector<8x128xf32>
    %203 = arith.addf %200, %202 : vector<8x128xf32>
    %204 = vector.broadcast %22 : f32 to vector<8x128xf32>
    %205 = arith.addf %203, %204 : vector<8x128xf32>
    %cst_208 = arith.constant 5.000000e-01 : f32
    %206 = vector.broadcast %cst_208 : f32 to vector<8x128xf32>
    %207 = arith.mulf %206, %205 : vector<8x128xf32>
    %cst_209 = arith.constant 0.707106769 : f32
    %208 = vector.broadcast %cst_209 : f32 to vector<8x128xf32>
    %209 = arith.mulf %205, %208 : vector<8x128xf32>
    %210 = math.erf %209 : vector<8x128xf32>
    %cst_210 = arith.constant 1.000000e+00 : f32
    %211 = vector.broadcast %cst_210 : f32 to vector<8x128xf32>
    %212 = arith.addf %211, %210 : vector<8x128xf32>
    %213 = arith.mulf %207, %212 : vector<8x128xf32>
    %214 = vector.broadcast %7 : f32 to vector<8x128xf32>
    %215 = arith.mulf %214, %106 : vector<8x128xf32>
    %216 = vector.broadcast %15 : f32 to vector<8x128xf32>
    %217 = arith.mulf %216, %108 : vector<8x128xf32>
    %218 = arith.addf %215, %217 : vector<8x128xf32>
    %219 = vector.broadcast %23 : f32 to vector<8x128xf32>
    %220 = arith.addf %218, %219 : vector<8x128xf32>
    %cst_211 = arith.constant 5.000000e-01 : f32
    %221 = vector.broadcast %cst_211 : f32 to vector<8x128xf32>
    %222 = arith.mulf %221, %220 : vector<8x128xf32>
    %cst_212 = arith.constant 0.707106769 : f32
    %223 = vector.broadcast %cst_212 : f32 to vector<8x128xf32>
    %224 = arith.mulf %220, %223 : vector<8x128xf32>
    %225 = math.erf %224 : vector<8x128xf32>
    %cst_213 = arith.constant 1.000000e+00 : f32
    %226 = vector.broadcast %cst_213 : f32 to vector<8x128xf32>
    %227 = arith.addf %226, %225 : vector<8x128xf32>
    %228 = arith.mulf %222, %227 : vector<8x128xf32>
    %229 = vector.broadcast %24 : f32 to vector<8x128xf32>
    %230 = arith.mulf %229, %123 : vector<8x128xf32>
    %231 = vector.broadcast %32 : f32 to vector<8x128xf32>
    %232 = arith.mulf %231, %138 : vector<8x128xf32>
    %233 = arith.addf %230, %232 : vector<8x128xf32>
    %234 = vector.broadcast %40 : f32 to vector<8x128xf32>
    %235 = arith.mulf %234, %153 : vector<8x128xf32>
    %236 = arith.addf %233, %235 : vector<8x128xf32>
    %237 = vector.broadcast %48 : f32 to vector<8x128xf32>
    %238 = arith.mulf %237, %168 : vector<8x128xf32>
    %239 = arith.addf %236, %238 : vector<8x128xf32>
    %240 = vector.broadcast %56 : f32 to vector<8x128xf32>
    %241 = arith.mulf %240, %183 : vector<8x128xf32>
    %242 = arith.addf %239, %241 : vector<8x128xf32>
    %243 = vector.broadcast %64 : f32 to vector<8x128xf32>
    %244 = arith.mulf %243, %198 : vector<8x128xf32>
    %245 = arith.addf %242, %244 : vector<8x128xf32>
    %246 = vector.broadcast %72 : f32 to vector<8x128xf32>
    %247 = arith.mulf %246, %213 : vector<8x128xf32>
    %248 = arith.addf %245, %247 : vector<8x128xf32>
    %249 = vector.broadcast %80 : f32 to vector<8x128xf32>
    %250 = arith.mulf %249, %228 : vector<8x128xf32>
    %251 = arith.addf %248, %250 : vector<8x128xf32>
    %252 = vector.broadcast %88 : f32 to vector<8x128xf32>
    %253 = arith.addf %251, %252 : vector<8x128xf32>
    %cst_214 = arith.constant 5.000000e-01 : f32
    %254 = vector.broadcast %cst_214 : f32 to vector<8x128xf32>
    %255 = arith.mulf %254, %253 : vector<8x128xf32>
    %cst_215 = arith.constant 0.707106769 : f32
    %256 = vector.broadcast %cst_215 : f32 to vector<8x128xf32>
    %257 = arith.mulf %253, %256 : vector<8x128xf32>
    %258 = math.erf %257 : vector<8x128xf32>
    %cst_216 = arith.constant 1.000000e+00 : f32
    %259 = vector.broadcast %cst_216 : f32 to vector<8x128xf32>
    %260 = arith.addf %259, %258 : vector<8x128xf32>
    %261 = arith.mulf %255, %260 : vector<8x128xf32>
    %262 = vector.broadcast %25 : f32 to vector<8x128xf32>
    %263 = arith.mulf %262, %123 : vector<8x128xf32>
    %264 = vector.broadcast %33 : f32 to vector<8x128xf32>
    %265 = arith.mulf %264, %138 : vector<8x128xf32>
    %266 = arith.addf %263, %265 : vector<8x128xf32>
    %267 = vector.broadcast %41 : f32 to vector<8x128xf32>
    %268 = arith.mulf %267, %153 : vector<8x128xf32>
    %269 = arith.addf %266, %268 : vector<8x128xf32>
    %270 = vector.broadcast %49 : f32 to vector<8x128xf32>
    %271 = arith.mulf %270, %168 : vector<8x128xf32>
    %272 = arith.addf %269, %271 : vector<8x128xf32>
    %273 = vector.broadcast %57 : f32 to vector<8x128xf32>
    %274 = arith.mulf %273, %183 : vector<8x128xf32>
    %275 = arith.addf %272, %274 : vector<8x128xf32>
    %276 = vector.broadcast %65 : f32 to vector<8x128xf32>
    %277 = arith.mulf %276, %198 : vector<8x128xf32>
    %278 = arith.addf %275, %277 : vector<8x128xf32>
    %279 = vector.broadcast %73 : f32 to vector<8x128xf32>
    %280 = arith.mulf %279, %213 : vector<8x128xf32>
    %281 = arith.addf %278, %280 : vector<8x128xf32>
    %282 = vector.broadcast %81 : f32 to vector<8x128xf32>
    %283 = arith.mulf %282, %228 : vector<8x128xf32>
    %284 = arith.addf %281, %283 : vector<8x128xf32>
    %285 = vector.broadcast %89 : f32 to vector<8x128xf32>
    %286 = arith.addf %284, %285 : vector<8x128xf32>
    %cst_217 = arith.constant 5.000000e-01 : f32
    %287 = vector.broadcast %cst_217 : f32 to vector<8x128xf32>
    %288 = arith.mulf %287, %286 : vector<8x128xf32>
    %cst_218 = arith.constant 0.707106769 : f32
    %289 = vector.broadcast %cst_218 : f32 to vector<8x128xf32>
    %290 = arith.mulf %286, %289 : vector<8x128xf32>
    %291 = math.erf %290 : vector<8x128xf32>
    %cst_219 = arith.constant 1.000000e+00 : f32
    %292 = vector.broadcast %cst_219 : f32 to vector<8x128xf32>
    %293 = arith.addf %292, %291 : vector<8x128xf32>
    %294 = arith.mulf %288, %293 : vector<8x128xf32>
    %295 = vector.broadcast %26 : f32 to vector<8x128xf32>
    %296 = arith.mulf %295, %123 : vector<8x128xf32>
    %297 = vector.broadcast %34 : f32 to vector<8x128xf32>
    %298 = arith.mulf %297, %138 : vector<8x128xf32>
    %299 = arith.addf %296, %298 : vector<8x128xf32>
    %300 = vector.broadcast %42 : f32 to vector<8x128xf32>
    %301 = arith.mulf %300, %153 : vector<8x128xf32>
    %302 = arith.addf %299, %301 : vector<8x128xf32>
    %303 = vector.broadcast %50 : f32 to vector<8x128xf32>
    %304 = arith.mulf %303, %168 : vector<8x128xf32>
    %305 = arith.addf %302, %304 : vector<8x128xf32>
    %306 = vector.broadcast %58 : f32 to vector<8x128xf32>
    %307 = arith.mulf %306, %183 : vector<8x128xf32>
    %308 = arith.addf %305, %307 : vector<8x128xf32>
    %309 = vector.broadcast %66 : f32 to vector<8x128xf32>
    %310 = arith.mulf %309, %198 : vector<8x128xf32>
    %311 = arith.addf %308, %310 : vector<8x128xf32>
    %312 = vector.broadcast %74 : f32 to vector<8x128xf32>
    %313 = arith.mulf %312, %213 : vector<8x128xf32>
    %314 = arith.addf %311, %313 : vector<8x128xf32>
    %315 = vector.broadcast %82 : f32 to vector<8x128xf32>
    %316 = arith.mulf %315, %228 : vector<8x128xf32>
    %317 = arith.addf %314, %316 : vector<8x128xf32>
    %318 = vector.broadcast %90 : f32 to vector<8x128xf32>
    %319 = arith.addf %317, %318 : vector<8x128xf32>
    %cst_220 = arith.constant 5.000000e-01 : f32
    %320 = vector.broadcast %cst_220 : f32 to vector<8x128xf32>
    %321 = arith.mulf %320, %319 : vector<8x128xf32>
    %cst_221 = arith.constant 0.707106769 : f32
    %322 = vector.broadcast %cst_221 : f32 to vector<8x128xf32>
    %323 = arith.mulf %319, %322 : vector<8x128xf32>
    %324 = math.erf %323 : vector<8x128xf32>
    %cst_222 = arith.constant 1.000000e+00 : f32
    %325 = vector.broadcast %cst_222 : f32 to vector<8x128xf32>
    %326 = arith.addf %325, %324 : vector<8x128xf32>
    %327 = arith.mulf %321, %326 : vector<8x128xf32>
    %328 = vector.broadcast %27 : f32 to vector<8x128xf32>
    %329 = arith.mulf %328, %123 : vector<8x128xf32>
    %330 = vector.broadcast %35 : f32 to vector<8x128xf32>
    %331 = arith.mulf %330, %138 : vector<8x128xf32>
    %332 = arith.addf %329, %331 : vector<8x128xf32>
    %333 = vector.broadcast %43 : f32 to vector<8x128xf32>
    %334 = arith.mulf %333, %153 : vector<8x128xf32>
    %335 = arith.addf %332, %334 : vector<8x128xf32>
    %336 = vector.broadcast %51 : f32 to vector<8x128xf32>
    %337 = arith.mulf %336, %168 : vector<8x128xf32>
    %338 = arith.addf %335, %337 : vector<8x128xf32>
    %339 = vector.broadcast %59 : f32 to vector<8x128xf32>
    %340 = arith.mulf %339, %183 : vector<8x128xf32>
    %341 = arith.addf %338, %340 : vector<8x128xf32>
    %342 = vector.broadcast %67 : f32 to vector<8x128xf32>
    %343 = arith.mulf %342, %198 : vector<8x128xf32>
    %344 = arith.addf %341, %343 : vector<8x128xf32>
    %345 = vector.broadcast %75 : f32 to vector<8x128xf32>
    %346 = arith.mulf %345, %213 : vector<8x128xf32>
    %347 = arith.addf %344, %346 : vector<8x128xf32>
    %348 = vector.broadcast %83 : f32 to vector<8x128xf32>
    %349 = arith.mulf %348, %228 : vector<8x128xf32>
    %350 = arith.addf %347, %349 : vector<8x128xf32>
    %351 = vector.broadcast %91 : f32 to vector<8x128xf32>
    %352 = arith.addf %350, %351 : vector<8x128xf32>
    %cst_223 = arith.constant 5.000000e-01 : f32
    %353 = vector.broadcast %cst_223 : f32 to vector<8x128xf32>
    %354 = arith.mulf %353, %352 : vector<8x128xf32>
    %cst_224 = arith.constant 0.707106769 : f32
    %355 = vector.broadcast %cst_224 : f32 to vector<8x128xf32>
    %356 = arith.mulf %352, %355 : vector<8x128xf32>
    %357 = math.erf %356 : vector<8x128xf32>
    %cst_225 = arith.constant 1.000000e+00 : f32
    %358 = vector.broadcast %cst_225 : f32 to vector<8x128xf32>
    %359 = arith.addf %358, %357 : vector<8x128xf32>
    %360 = arith.mulf %354, %359 : vector<8x128xf32>
    %361 = vector.broadcast %28 : f32 to vector<8x128xf32>
    %362 = arith.mulf %361, %123 : vector<8x128xf32>
    %363 = vector.broadcast %36 : f32 to vector<8x128xf32>
    %364 = arith.mulf %363, %138 : vector<8x128xf32>
    %365 = arith.addf %362, %364 : vector<8x128xf32>
    %366 = vector.broadcast %44 : f32 to vector<8x128xf32>
    %367 = arith.mulf %366, %153 : vector<8x128xf32>
    %368 = arith.addf %365, %367 : vector<8x128xf32>
    %369 = vector.broadcast %52 : f32 to vector<8x128xf32>
    %370 = arith.mulf %369, %168 : vector<8x128xf32>
    %371 = arith.addf %368, %370 : vector<8x128xf32>
    %372 = vector.broadcast %60 : f32 to vector<8x128xf32>
    %373 = arith.mulf %372, %183 : vector<8x128xf32>
    %374 = arith.addf %371, %373 : vector<8x128xf32>
    %375 = vector.broadcast %68 : f32 to vector<8x128xf32>
    %376 = arith.mulf %375, %198 : vector<8x128xf32>
    %377 = arith.addf %374, %376 : vector<8x128xf32>
    %378 = vector.broadcast %76 : f32 to vector<8x128xf32>
    %379 = arith.mulf %378, %213 : vector<8x128xf32>
    %380 = arith.addf %377, %379 : vector<8x128xf32>
    %381 = vector.broadcast %84 : f32 to vector<8x128xf32>
    %382 = arith.mulf %381, %228 : vector<8x128xf32>
    %383 = arith.addf %380, %382 : vector<8x128xf32>
    %384 = vector.broadcast %92 : f32 to vector<8x128xf32>
    %385 = arith.addf %383, %384 : vector<8x128xf32>
    %cst_226 = arith.constant 5.000000e-01 : f32
    %386 = vector.broadcast %cst_226 : f32 to vector<8x128xf32>
    %387 = arith.mulf %386, %385 : vector<8x128xf32>
    %cst_227 = arith.constant 0.707106769 : f32
    %388 = vector.broadcast %cst_227 : f32 to vector<8x128xf32>
    %389 = arith.mulf %385, %388 : vector<8x128xf32>
    %390 = math.erf %389 : vector<8x128xf32>
    %cst_228 = arith.constant 1.000000e+00 : f32
    %391 = vector.broadcast %cst_228 : f32 to vector<8x128xf32>
    %392 = arith.addf %391, %390 : vector<8x128xf32>
    %393 = arith.mulf %387, %392 : vector<8x128xf32>
    %394 = vector.broadcast %29 : f32 to vector<8x128xf32>
    %395 = arith.mulf %394, %123 : vector<8x128xf32>
    %396 = vector.broadcast %37 : f32 to vector<8x128xf32>
    %397 = arith.mulf %396, %138 : vector<8x128xf32>
    %398 = arith.addf %395, %397 : vector<8x128xf32>
    %399 = vector.broadcast %45 : f32 to vector<8x128xf32>
    %400 = arith.mulf %399, %153 : vector<8x128xf32>
    %401 = arith.addf %398, %400 : vector<8x128xf32>
    %402 = vector.broadcast %53 : f32 to vector<8x128xf32>
    %403 = arith.mulf %402, %168 : vector<8x128xf32>
    %404 = arith.addf %401, %403 : vector<8x128xf32>
    %405 = vector.broadcast %61 : f32 to vector<8x128xf32>
    %406 = arith.mulf %405, %183 : vector<8x128xf32>
    %407 = arith.addf %404, %406 : vector<8x128xf32>
    %408 = vector.broadcast %69 : f32 to vector<8x128xf32>
    %409 = arith.mulf %408, %198 : vector<8x128xf32>
    %410 = arith.addf %407, %409 : vector<8x128xf32>
    %411 = vector.broadcast %77 : f32 to vector<8x128xf32>
    %412 = arith.mulf %411, %213 : vector<8x128xf32>
    %413 = arith.addf %410, %412 : vector<8x128xf32>
    %414 = vector.broadcast %85 : f32 to vector<8x128xf32>
    %415 = arith.mulf %414, %228 : vector<8x128xf32>
    %416 = arith.addf %413, %415 : vector<8x128xf32>
    %417 = vector.broadcast %93 : f32 to vector<8x128xf32>
    %418 = arith.addf %416, %417 : vector<8x128xf32>
    %cst_229 = arith.constant 5.000000e-01 : f32
    %419 = vector.broadcast %cst_229 : f32 to vector<8x128xf32>
    %420 = arith.mulf %419, %418 : vector<8x128xf32>
    %cst_230 = arith.constant 0.707106769 : f32
    %421 = vector.broadcast %cst_230 : f32 to vector<8x128xf32>
    %422 = arith.mulf %418, %421 : vector<8x128xf32>
    %423 = math.erf %422 : vector<8x128xf32>
    %cst_231 = arith.constant 1.000000e+00 : f32
    %424 = vector.broadcast %cst_231 : f32 to vector<8x128xf32>
    %425 = arith.addf %424, %423 : vector<8x128xf32>
    %426 = arith.mulf %420, %425 : vector<8x128xf32>
    %427 = vector.broadcast %30 : f32 to vector<8x128xf32>
    %428 = arith.mulf %427, %123 : vector<8x128xf32>
    %429 = vector.broadcast %38 : f32 to vector<8x128xf32>
    %430 = arith.mulf %429, %138 : vector<8x128xf32>
    %431 = arith.addf %428, %430 : vector<8x128xf32>
    %432 = vector.broadcast %46 : f32 to vector<8x128xf32>
    %433 = arith.mulf %432, %153 : vector<8x128xf32>
    %434 = arith.addf %431, %433 : vector<8x128xf32>
    %435 = vector.broadcast %54 : f32 to vector<8x128xf32>
    %436 = arith.mulf %435, %168 : vector<8x128xf32>
    %437 = arith.addf %434, %436 : vector<8x128xf32>
    %438 = vector.broadcast %62 : f32 to vector<8x128xf32>
    %439 = arith.mulf %438, %183 : vector<8x128xf32>
    %440 = arith.addf %437, %439 : vector<8x128xf32>
    %441 = vector.broadcast %70 : f32 to vector<8x128xf32>
    %442 = arith.mulf %441, %198 : vector<8x128xf32>
    %443 = arith.addf %440, %442 : vector<8x128xf32>
    %444 = vector.broadcast %78 : f32 to vector<8x128xf32>
    %445 = arith.mulf %444, %213 : vector<8x128xf32>
    %446 = arith.addf %443, %445 : vector<8x128xf32>
    %447 = vector.broadcast %86 : f32 to vector<8x128xf32>
    %448 = arith.mulf %447, %228 : vector<8x128xf32>
    %449 = arith.addf %446, %448 : vector<8x128xf32>
    %450 = vector.broadcast %94 : f32 to vector<8x128xf32>
    %451 = arith.addf %449, %450 : vector<8x128xf32>
    %cst_232 = arith.constant 5.000000e-01 : f32
    %452 = vector.broadcast %cst_232 : f32 to vector<8x128xf32>
    %453 = arith.mulf %452, %451 : vector<8x128xf32>
    %cst_233 = arith.constant 0.707106769 : f32
    %454 = vector.broadcast %cst_233 : f32 to vector<8x128xf32>
    %455 = arith.mulf %451, %454 : vector<8x128xf32>
    %456 = math.erf %455 : vector<8x128xf32>
    %cst_234 = arith.constant 1.000000e+00 : f32
    %457 = vector.broadcast %cst_234 : f32 to vector<8x128xf32>
    %458 = arith.addf %457, %456 : vector<8x128xf32>
    %459 = arith.mulf %453, %458 : vector<8x128xf32>
    %460 = vector.broadcast %31 : f32 to vector<8x128xf32>
    %461 = arith.mulf %460, %123 : vector<8x128xf32>
    %462 = vector.broadcast %39 : f32 to vector<8x128xf32>
    %463 = arith.mulf %462, %138 : vector<8x128xf32>
    %464 = arith.addf %461, %463 : vector<8x128xf32>
    %465 = vector.broadcast %47 : f32 to vector<8x128xf32>
    %466 = arith.mulf %465, %153 : vector<8x128xf32>
    %467 = arith.addf %464, %466 : vector<8x128xf32>
    %468 = vector.broadcast %55 : f32 to vector<8x128xf32>
    %469 = arith.mulf %468, %168 : vector<8x128xf32>
    %470 = arith.addf %467, %469 : vector<8x128xf32>
    %471 = vector.broadcast %63 : f32 to vector<8x128xf32>
    %472 = arith.mulf %471, %183 : vector<8x128xf32>
    %473 = arith.addf %470, %472 : vector<8x128xf32>
    %474 = vector.broadcast %71 : f32 to vector<8x128xf32>
    %475 = arith.mulf %474, %198 : vector<8x128xf32>
    %476 = arith.addf %473, %475 : vector<8x128xf32>
    %477 = vector.broadcast %79 : f32 to vector<8x128xf32>
    %478 = arith.mulf %477, %213 : vector<8x128xf32>
    %479 = arith.addf %476, %478 : vector<8x128xf32>
    %480 = vector.broadcast %87 : f32 to vector<8x128xf32>
    %481 = arith.mulf %480, %228 : vector<8x128xf32>
    %482 = arith.addf %479, %481 : vector<8x128xf32>
    %483 = vector.broadcast %95 : f32 to vector<8x128xf32>
    %484 = arith.addf %482, %483 : vector<8x128xf32>
    %cst_235 = arith.constant 5.000000e-01 : f32
    %485 = vector.broadcast %cst_235 : f32 to vector<8x128xf32>
    %486 = arith.mulf %485, %484 : vector<8x128xf32>
    %cst_236 = arith.constant 0.707106769 : f32
    %487 = vector.broadcast %cst_236 : f32 to vector<8x128xf32>
    %488 = arith.mulf %484, %487 : vector<8x128xf32>
    %489 = math.erf %488 : vector<8x128xf32>
    %cst_237 = arith.constant 1.000000e+00 : f32
    %490 = vector.broadcast %cst_237 : f32 to vector<8x128xf32>
    %491 = arith.addf %490, %489 : vector<8x128xf32>
    %492 = arith.mulf %486, %491 : vector<8x128xf32>
    %493 = vector.broadcast %96 : f32 to vector<8x128xf32>
    %494 = arith.mulf %493, %261 : vector<8x128xf32>
    %495 = vector.broadcast %97 : f32 to vector<8x128xf32>
    %496 = arith.mulf %495, %294 : vector<8x128xf32>
    %497 = arith.addf %494, %496 : vector<8x128xf32>
    %498 = vector.broadcast %98 : f32 to vector<8x128xf32>
    %499 = arith.mulf %498, %327 : vector<8x128xf32>
    %500 = arith.addf %497, %499 : vector<8x128xf32>
    %501 = vector.broadcast %99 : f32 to vector<8x128xf32>
    %502 = arith.mulf %501, %360 : vector<8x128xf32>
    %503 = arith.addf %500, %502 : vector<8x128xf32>
    %504 = vector.broadcast %100 : f32 to vector<8x128xf32>
    %505 = arith.mulf %504, %393 : vector<8x128xf32>
    %506 = arith.addf %503, %505 : vector<8x128xf32>
    %507 = vector.broadcast %101 : f32 to vector<8x128xf32>
    %508 = arith.mulf %507, %426 : vector<8x128xf32>
    %509 = arith.addf %506, %508 : vector<8x128xf32>
    %510 = vector.broadcast %102 : f32 to vector<8x128xf32>
    %511 = arith.mulf %510, %459 : vector<8x128xf32>
    %512 = arith.addf %509, %511 : vector<8x128xf32>
    %513 = vector.broadcast %103 : f32 to vector<8x128xf32>
    %514 = arith.mulf %513, %492 : vector<8x128xf32>
    %515 = arith.addf %512, %514 : vector<8x128xf32>
    %516 = vector.broadcast %104 : f32 to vector<8x128xf32>
    %517 = arith.addf %515, %516 : vector<8x128xf32>
    %c0_238 = arith.constant 0 : index
    %c0_239 = arith.constant 0 : index
    %c0_240 = arith.constant 0 : index
    %518 = vector.load %arg8[%c0_238, %c0_239, %c0_240] : memref<1x8x128xf32, #tpu.memory_space<vmem>>, vector<1x8x128xf32>
    %519 = vector.shape_cast %518 : vector<1x8x128xf32> to vector<8x128xf32>
    %520 = vector.shape_cast %517 : vector<8x128xf32> to vector<1x8x128xf32>
    tpu.vector_store %arg8[%c0_238, %c0_239, %c0_240], %520 {strides = array<i32>} : memref<1x8x128xf32, #tpu.memory_space<vmem>>, vector<1x8x128xf32>,
    return
  }
  func.func @transform_0(%arg0: i32) -> (i32, i32, i32) {
    %c0_i32 = arith.constant 0 : i32
    %c0_i32_0 = arith.constant 0 : i32
    %c0_i32_1 = arith.constant 0 : i32
    return %c0_i32, %arg0, %c0_i32_0 : i32, i32, i32
  }
  func.func @transform_1(%arg0: i32) -> (i32, i32) {
    %c0_i32 = arith.constant 0 : i32
    %c0_i32_0 = arith.constant 0 : i32
    %c0_i32_1 = arith.constant 0 : i32
    return %c0_i32, %c0_i32_0 : i32, i32
  }
  func.func @transform_2(%arg0: i32) -> i32 {
    %c0_i32 = arith.constant 0 : i32
    %c0_i32_0 = arith.constant 0 : i32
    return %c0_i32 : i32
  }
  func.func @transform_3(%arg0: i32) -> (i32, i32) {
    %c0_i32 = arith.constant 0 : i32
    %c0_i32_0 = arith.constant 0 : i32
    %c0_i32_1 = arith.constant 0 : i32
    return %c0_i32, %c0_i32_0 : i32, i32
  }
  func.func @transform_4(%arg0: i32) -> i32 {
    %c0_i32 = arith.constant 0 : i32
    %c0_i32_0 = arith.constant 0 : i32
    return %c0_i32 : i32
  }
  func.func @transform_5(%arg0: i32) -> (i32, i32) {
    %c0_i32 = arith.constant 0 : i32
    %c0_i32_0 = arith.constant 0 : i32
    %c0_i32_1 = arith.constant 0 : i32
    return %c0_i32, %c0_i32_0 : i32, i32
  }
  func.func @transform_6(%arg0: i32) -> i32 {
    %c0_i32 = arith.constant 0 : i32
    %c0_i32_0 = arith.constant 0 : i32
    return %c0_i32 : i32
  }
  func.func @transform_7(%arg0: i32) -> (i32, i32, i32) {
    %c0_i32 = arith.constant 0 : i32
    %c0_i32_0 = arith.constant 0 : i32
    %c0_i32_1 = arith.constant 0 : i32
    return %c0_i32, %arg0, %c0_i32_0 : i32, i32, i32
  }
}

</mosaic_0001>

<bundles_post_ra>
// kernel: mlp_forward.1
= control target key start
LH: loop header
LB: loop body
LE: loop exit
PB: predicated region body
PF: predicated region fallthrough
CT: control target
= control target key end

     0   :  { %13 = vsyncpa [#allocation4], 0  ;;  %s1276_s0 = inlined_call_operand.vmem [shape: f32[2,8,128], index: 0, kind: input, shape index: {}]   ;;  %s1277_s1 = inlined_call_operand.vmem [shape: f32[2,8], index: 1, kind: input, shape index: {}]   ;;  %s1278_s2 = inlined_call_operand.vmem [shape: f32[8], index: 2, kind: input, shape index: {}]   ;;  %s1279_s3 = inlined_call_operand.vmem [shape: f32[8,8], index: 3, kind: input, shape index: {}]   ;;  %s1280_s4 = inlined_call_operand.vmem [shape: f32[8], index: 4, kind: input, shape index: {}]   ;;  %s1281_s5 = inlined_call_operand.vmem [shape: f32[8,1], index: 5, kind: input, shape index: {}]   ;;  %s1282_s6 = inlined_call_operand.<no memory space> [shape: f32[1], index: 6, kind: input, shape index: {}]   ;;  %s1283_s7 = inlined_call_operand.vmem [shape: f32[1,8,128], index: 7, kind: output, shape index: {}]  }
   0x1   :  { %14 = vsyncpa [#allocation6], 0  ;;  %s34_s26 = sshll.u32 %s1278_s2, 4  ;;  %s35_s26 = int_to_ptr.vmem [resolvable:$true] %s34_s26 }
   0x2   :  { %15 = vsyncpa [#allocation9], 0  ;;  %s54_s29 = sshll.u32 %s1280_s4, 4  ;;  %s700_s30 = scalar_lea.vmem %s35_s26, 16  ;;  %s55_s29 = int_to_ptr.vmem [resolvable:$true] %s54_s29 }
   0x3   :  { %p701_p0 = scmp.ne.s32.totalorder %s35_s26, %s700_s30  ;;  %p705_p1 = scmp.lt.s32.totalorder %s35_s26, %s35_s26 }
   0x4   :  { %p706_p2 = scmp.lt.s32.totalorder %s700_s30, %s700_s30 }
   0x6   :  { %p707_p3 = por %p706_p2, %p705_p1 }
   0x8   :  { %p708_p4 = pnand %p707_p3, %p701_p0 }
   0xa   :  { %711 = shalt.err (!%p708_p4)
}
   0xb   :  { %s766_s8 = smov [#allocation5]   ;;  %s712_s9 = scalar_lea.vmem %s55_s29, 16 }
   0xc   :  { %37 = dma.vmem_to_smem %s35_s26, 16, %s766_s8, [#allocation6]  }
   0xd   :  { %p713_p5 = scmp.ne.s32.totalorder %s55_s29, %s712_s9  ;;  %p717_p6 = scmp.lt.s32.totalorder %s55_s29, %s55_s29 }
   0xe   :  { %p718_p7 = scmp.lt.s32.totalorder %s712_s9, %s712_s9 }
  0x10   :  { %p719_p8 = por %p718_p7, %p717_p6 }
  0x12   :  { %p720_p9 = pnand %p719_p8, %p713_p5 }
  0x14   :  { %723 = shalt.err (!%p720_p9)
}
  0x15   :  { %s767_s2 = smov [#allocation8]   ;;  %s24_s11 = sshll.u32 %s1277_s1, 4  ;;  %s25_s11 = int_to_ptr.vmem [resolvable:$true] %s24_s11 }
  0x16   :  { %57 = dma.vmem_to_smem %s55_s29, 16, %s767_s2, [#allocation9]  }
  0x17   :  { %s44_s14 = sshll.u32 %s1279_s3, 4  ;;  %s724_s15 = scalar_lea.vmem %s25_s11, 32  ;;  %s45_s14 = int_to_ptr.vmem [resolvable:$true] %s44_s14 }
  0x18   :  { %p725_p10 = scmp.ne.s32.totalorder %s25_s11, %s724_s15  ;;  %p729_p11 = scmp.lt.s32.totalorder %s25_s11, %s25_s11 }
  0x19   :  { %p730_p12 = scmp.lt.s32.totalorder %s724_s15, %s724_s15 }
  0x1b   :  { %p731_p13 = por %p730_p12, %p729_p11 }
  0x1d   :  { %p732_p0 = pnand %p731_p13, %p725_p10 }
  0x1f   :  { %735 = shalt.err (!%p732_p0)
}
  0x20   :  { %s768_s16 = smov [#allocation3]   ;;  %s736_s17 = scalar_lea.vmem %s45_s14, 128 }
  0x21   :  { %27 = dma.vmem_to_smem %s25_s11, 32, %s768_s16, [#allocation4]  }
  0x22   :  { %p737_p1 = scmp.ne.s32.totalorder %s45_s14, %s736_s17  ;;  %p741_p2 = scmp.lt.s32.totalorder %s45_s14, %s45_s14 }
  0x23   :  { %p742_p3 = scmp.lt.s32.totalorder %s736_s17, %s736_s17 }
  0x25   :  { %p743_p4 = por %p742_p3, %p741_p2 }
  0x27   :  { %p744_p5 = pnand %p743_p4, %p737_p1 }
  0x29   :  { %747 = shalt.err (!%p744_p5)
}
  0x2a   :  { %s769_s1 = smov [#allocation7]   ;;  %s64_s19 = sshll.u32 %s1281_s5, 4  ;;  %s65_s19 = int_to_ptr.vmem [resolvable:$true] %s64_s19 }
  0x2b   :  { %47 = dma.vmem_to_smem %s45_s14, 128, %s769_s1, [#allocation6]  }
  0x2c   :  { %s748_s20 = scalar_lea.vmem %s65_s19, 128  ;;  %p753_p7 = scmp.lt.s32.totalorder %s65_s19, %s65_s19 }
  0x2d   :  { %p749_p6 = scmp.ne.s32.totalorder %s65_s19, %s748_s20  ;;  %p754_p8 = scmp.lt.s32.totalorder %s748_s20, %s748_s20 }
  0x2f   :  { %p755_p9 = por %p754_p8, %p753_p7 }
  0x31   :  { %p756_p10 = pnand %p755_p9, %p749_p6 }
  0x33   :  { %759 = shalt.err (!%p756_p10)
}
  0x34   :  { %s770_s21 = smov [#allocation10]  }
  0x35   :  { %67 = dma.vmem_to_smem %s65_s19, 128, %s770_s21, [#allocation9]  }
  0x36   :  { %760 = dma.done.wait [#allocation4], 32  }
  0x37   :  { %761 = vsyncadd [#allocation4], 4294967264 }
  0x38   :  { %762 = dma.done.wait [#allocation6], 144  }
  0x39   :  { %763 = vsyncadd [#allocation6], 4294967152 }
  0x3a   :  { %764 = dma.done.wait [#allocation9], 144  }
  0x3b   :  { %765 = vsyncadd [#allocation9], 4294967152 }
  0x3c   :  { %85 = sfence }
  0x3d   :  { %s86_s22 = sld [smem:[#allocation3]]  ;;  %s563_s23 = sld [smem:[#allocation3 + $0x1]]  ;;  %v841_v0 = vld [vmem:[%s1276_s0] sm:$0xff]  ;;  %v856_v5 = vld [vmem:[%s1276_s0 + $0x8] sm:$0xff] }
  0x3e   :  { %s564_s5 = sld [smem:[#allocation3 + $0x2]]  ;;  %s565_s24 = sld [smem:[#allocation3 + $0x3]] }
  0x3f   :  { %s566_s25 = sld [smem:[#allocation3 + $0x4]]  ;;  %s567_s26 = sld [smem:[#allocation3 + $0x5]] }
  0x40   :  { %s826_s27 = sld [smem:[#allocation3 + $0x6]]  ;;  %s828_s28 = sld [smem:[#allocation3 + $0x7]] }
  0x41   :  { %s830_s29 = sld [smem:[#allocation3 + $0x80]]  ;;  %s832_s30 = sld [smem:[#allocation3 + $0x81]] }
  0x42   :  { %s834_s8 = sld [smem:[#allocation3 + $0x82]]  ;;  %s836_s9 = sld [smem:[#allocation3 + $0x83]] }
  0x43   :  { %s843_s10 = sld [smem:[#allocation3 + $0x84]]  ;;  %s845_s11 = sld [smem:[#allocation3 + $0x85]]  ;;  %v194_v1 = vstv %s86_s22  ;;  %v206_v2 = vstv %s563_s23 }
  0x44   :  { %s847_s12 = sld [smem:[#allocation3 + $0x86]]  ;;  %v218_v3 = vstv %s564_s5  ;;  %v230_v4 = vstv %s565_s24  ;;  %s849_s13 = sld [smem:[#allocation5]]  ;;  %v195_v6 = vmul.f32 %v194_v1, %v841_v0  ;;  %v207_v7 = vmul.f32 %v206_v2, %v841_v0 }
  0x45   :  { %s851_s14 = sld [smem:[#allocation5 + $0x1]]  ;;  %v242_v8 = vstv %s566_s25  ;;  %v254_v9 = vstv %s567_s26  ;;  %s860_s17 = sld [smem:[#allocation5 + $0x2]]  ;;  %v219_v10 = vmul.f32 %v218_v3, %v841_v0  ;;  %v231_v11 = vmul.f32 %v230_v4, %v841_v0 }
  0x46   :  { %s862_s1 = sld [smem:[#allocation5 + $0x3]]  ;;  %v243_v12 = vmul.f32 %v242_v8, %v841_v0  ;;  %v255_v13 = vmul.f32 %v254_v9, %v841_v0  ;;  %s868_s0 = sld [smem:[#allocation5 + $0x4]]  ;;  %v266_v16 = vstv %s826_s27  ;;  %v278_v17 = vstv %s828_s28 }
  0x47   :  { %s870_s3 = sld [smem:[#allocation5 + $0x5]]  ;;  %v196_v14 = vstv %s830_s29  ;;  %v208_v15 = vstv %s832_s30  ;;  %s876_s18 = sld [smem:[#allocation3 + $0x87]]  ;;  %v267_v43 = vmul.f32 %v266_v16, %v841_v0  ;;  %v279_v47 = vmul.f32 %v278_v17, %v841_v0 }
  0x48   :  { %v197_v18 = vmul.f32 %v856_v5, %v196_v14  ;;  %v209_v19 = vmul.f32 %v856_v5, %v208_v15  ;;  %v220_v20 = vstv %s834_s8  ;;  %v232_v21 = vstv %s836_s9  ;;  %s882_s19 = sld [smem:[#allocation5 + $0x6]]  ;;  %s888_s20 = sld [smem:[#allocation5 + $0x7]] }
  0x49   :  { %v221_v22 = vmul.f32 %v856_v5, %v220_v20  ;;  %v233_v23 = vmul.f32 %v856_v5, %v232_v21  ;;  %v244_v24 = vstv %s843_s10  ;;  %v256_v25 = vstv %s845_s11  ;;  %s896_s21 = sld [smem:[#allocation7]]  ;;  %s899_s22 = sld [smem:[#allocation7 + $0x1]] }
  0x4a   :  { %v198_v26 = vadd.f32 %v197_v18, %v195_v6  ;;  %v210_v27 = vadd.f32 %v209_v19, %v207_v7  ;;  %v245_v28 = vmul.f32 %v856_v5, %v244_v24  ;;  %v257_v29 = vmul.f32 %v856_v5, %v256_v25  ;;  %s901_s23 = sld [smem:[#allocation7 + $0x2]]  ;;  %s905_s5 = sld [smem:[#allocation7 + $0x3]] }
  0x4b   :  { %v199_v30 = vstv %s849_s13  ;;  %v211_v31 = vstv %s851_s14  ;;  %v222_v32 = vadd.f32 %v221_v22, %v219_v10  ;;  %v234_v33 = vadd.f32 %v233_v23, %v231_v11  ;;  %s907_s24 = sld [smem:[#allocation7 + $0x80]]  ;;  %s911_s25 = sld [smem:[#allocation7 + $0x4]] }
  0x4c   :  { %v200_v34 = vadd.f32 %v199_v30, %v198_v26  ;;  %v212_v35 = vadd.f32 %v211_v31, %v210_v27  ;;  %v223_v36 = vstv %s860_s17  ;;  %v235_v37 = vstv %s862_s1  ;;  %s913_s26 = sld [smem:[#allocation7 + $0x5]]  ;;  %s917_s27 = sld [smem:[#allocation7 + $0x81]] }
  0x4d   :  { %v246_v38 = vadd.f32 %v245_v28, %v243_v12  ;;  %v247_v39 = vstv %s868_s0  ;;  %v224_v40 = vadd.f32 %v223_v36, %v222_v32  ;;  %v258_v41 = vadd.f32 %v257_v29, %v255_v13  ;;  %s919_s28 = sld [smem:[#allocation7 + $0x82]]  ;;  %s923_s29 = sld [smem:[#allocation7 + $0x83]] }
  0x4e   :  { %v259_v42 = vstv %s870_s3  ;;  %v202_v44 = vmul.f32 0.70710677, %v200_v34  ;;  %v236_v45 = vadd.f32 %v235_v37, %v234_v33  ;;  %v268_v46 = vstv %s847_s12  ;;  %s925_s30 = sld [smem:[#allocation7 + $0x100]]  ;;  %s928_s8 = sld [smem:[#allocation7 + $0x101]] }
  0x4f   :  { %v214_v48 = vmul.f32 0.70710677, %v212_v35  ;;  %v248_v49 = vadd.f32 %v247_v39, %v246_v38  ;;  %v269_v50 = vmul.f32 %v856_v5, %v268_v46  ;;  %v280_v51 = vstv %s876_s18  ;;  %s930_s9 = sld [smem:[#allocation7 + $0x102]]  ;;  %s932_s2 = sld [smem:[#allocation7 + $0x84]] }
  0x50   :  { %668 = verf.f32 %v202_v44  ;;  %v260_v52 = vadd.f32 %v259_v42, %v258_v41  ;;  %v271_v53 = vstv %s882_s19  ;;  %v281_v54 = vmul.f32 %v856_v5, %v280_v51  ;;  %s934_s4 = sld [smem:[#allocation7 + $0x103]]  ;;  %s936_s10 = sld [smem:[#allocation7 + $0x104]] }
  0x51   :  { %670 = verf.f32 %v214_v48  ;;  %v226_v55 = vmul.f32 0.70710677, %v224_v40  ;;  %v270_v56 = vadd.f32 %v269_v50, %v267_v43  ;;  %v283_v57 = vstv %s888_s20  ;;  %s938_s11 = sld [smem:[#allocation7 + $0x180]]  ;;  %s940_s12 = sld [smem:[#allocation7 + $0x181]] }
  0x52   :  { %v238_v58 = vmul.f32 0.70710677, %v236_v45  ;;  %v282_v59 = vadd.f32 %v281_v54, %v279_v47  ;;  %v201_v60 = vmul.f32 0.5, %v200_v34  ;;  %v213_v61 = vmul.f32 0.5, %v212_v35  ;;  %s942_s13 = sld [smem:[#allocation7 + $0x182]]  ;;  %s950_s14 = sld [smem:[#allocation7 + $0x200]] }
  0x53   :  { %672 = verf.f32 %v226_v55  ;;  %v272_v62 = vadd.f32 %v271_v53, %v270_v56  ;;  %v225_v63 = vmul.f32 0.5, %v224_v40  ;;  %v250_v0 = vmul.f32 0.70710677, %v248_v49  ;;  %s952_s15 = sld [smem:[#allocation7 + $0x201]]  ;;  %s957_s16 = sld [smem:[#allocation7 + $0x202]] }
  0x54   :  { %674 = verf.f32 %v238_v58  ;;  %v284_v1 = vadd.f32 %v283_v57, %v282_v59  ;;  %v262_v2 = vmul.f32 0.70710677, %v260_v52  ;;  %v237_v3 = vmul.f32 0.5, %v236_v45  ;;  %s970_s17 = sld [smem:[#allocation7 + $0x280]]  ;;  %s984_s1 = sld [smem:[#allocation7 + $0x281]] }
  0x55   :  { %676 = verf.f32 %v250_v0  ;;  %v290_v4 = vstv %s896_s21  ;;  %v292_v5 = vstv %s907_s24  ;;  %v946_v6 = vmul.f32 0.5, %v248_v49  ;;  %s989_s0 = sld [smem:[#allocation7 + $0x300]]  ;;  %s991_s3 = sld [smem:[#allocation7 + $0x301]] }
  0x56   :  { %v948_v7 = vmul.f32 0.5, %v260_v52  ;;  %678 = verf.f32 %v262_v2  ;;  %v274_v8 = vmul.f32 0.70710677, %v272_v62  ;;  %v286_v9 = vmul.f32 0.70710677, %v284_v1  ;;  %s1004_s18 = sld [smem:[#allocation7 + $0x282]] }
  0x57   :  { %v320_v10 = vstv %s899_s22  ;;  %v322_v11 = vstv %s917_s27  ;;  %v350_v12 = vstv %s901_s23  ;;  %v959_v13 = vmul.f32 0.5, %v272_v62  ;;  %s1006_s19 = sld [smem:[#allocation7 + $0x302]]  ;;  %s1013_s20 = sld [smem:[#allocation7 + $0x380]] }
  0x58   :  { %680 = verf.f32 %v274_v8  ;;  %v961_v14 = vmul.f32 0.5, %v284_v1  ;;  %v352_v15 = vstv %s919_s28  ;;  %v295_v17 = vstv %s925_s30  ;;  %s1015_s21 = sld [smem:[#allocation7 + $0x381]]  ;;  %s1021_s22 = sld [smem:[#allocation7 + $0x382]] }
  0x59   :  { %682 = verf.f32 %v286_v9  ;;  %v325_v18 = vstv %s928_s8  ;;  %v355_v19 = vstv %s930_s9  ;;  %v380_v22 = vstv %s905_s5  ;;  %s1025_s23 = sld [smem:[#allocation7 + $0x183]]  ;;  %s1039_s27 = sld [smem:[#allocation8]] }
  0x5a   :  { %v669_v16 = vpop.eup %668  ;;  %v382_v23 = vstv %s923_s29  ;;  %v385_v24 = vstv %s934_s4  ;;  %v410_v26 = vstv %s911_s25  ;;  %v412_v27 = vstv %s932_s2  ;;  %s1032_s24 = sld [smem:[#allocation7 + $0x203]]  ;;  %s1041_s28 = sld [smem:[#allocation8 + $0x1]] }
  0x5b   :  { %v671_v20 = vpop.eup %670  ;;  %v204_v21 = vadd.f32 1.0, %v669_v16  ;;  %v415_v28 = vstv %s936_s10  ;;  %v298_v31 = vstv %s938_s11  ;;  %v328_v32 = vstv %s940_s12  ;;  %s1046_s30 = sld [smem:[#allocation7 + $0x85]]  ;;  %s1054_s11 = sld [smem:[#allocation7 + $0x184]] }
  0x5c   :  { %v216_v25 = vadd.f32 1.0, %v671_v20  ;;  %v440_v33 = vstv %s913_s26  ;;  %v301_v37 = vstv %s950_s14  ;;  %v358_v38 = vstv %s942_s13  ;;  %s1048_s8 = sld [smem:[#allocation7 + $0x105]]  ;;  %s1056_s12 = sld [smem:[#allocation7 + $0x283]] }
  0x5d   :  { %v673_v29 = vpop.eup %672  ;;  %v975_v30 = vmul.f32 %v204_v21, %v201_v60  ;;  %v331_v42 = vstv %s952_s15  ;;  %v361_v52 = vstv %s957_s16  ;;  %v304_v56 = vstv %s970_s17  ;;  %s1061_s13 = sld [smem:[#allocation7 + $0x6]]  ;;  %s1063_s14 = sld [smem:[#allocation7 + $0x185]] }
  0x5e   :  { %v675_v34 = vpop.eup %674  ;;  %v980_v35 = vmul.f32 %v216_v25, %v213_v61  ;;  %v228_v36 = vadd.f32 1.0, %v673_v29  ;;  %v337_v16 = vstv %s991_s3  ;;  %s1067_s9 = sld [smem:[#allocation7 + $0x303]]  ;;  %s1069_s15 = sld [smem:[#allocation8 + $0x2]] }
  0x5f   :  { %v240_v39 = vadd.f32 1.0, %v675_v34  ;;  %v291_v40 = vmul.f32 %v290_v4, %v975_v30  ;;  %v321_v41 = vmul.f32 %v320_v10, %v975_v30  ;;  %v677_v43 = vpop.eup %676  ;;  %v351_v47 = vmul.f32 %v350_v12, %v975_v30  ;;  %s1078_s16 = sld [smem:[#allocation7 + $0x383]]  ;;  %s1083_s17 = sld [smem:[#allocation7 + $0x204]] }
  0x60   :  { %v993_v44 = vmul.f32 %v228_v36, %v225_v63  ;;  %v293_v45 = vmul.f32 %v292_v5, %v980_v35  ;;  %v323_v46 = vmul.f32 %v322_v11, %v980_v35  ;;  %v679_v48 = vpop.eup %678  ;;  %v252_v50 = vadd.f32 1.0, %v677_v43  ;;  %s1089_s5 = sld [smem:[#allocation7 + $0x86]]  ;;  %s1105_s29 = sld [smem:[#allocation7 + $0x304]] }
  0x61   :  { %v998_v49 = vmul.f32 %v240_v39, %v237_v3  ;;  %v353_v51 = vmul.f32 %v352_v15, %v980_v35  ;;  %v264_v53 = vadd.f32 1.0, %v679_v48  ;;  %v307_v10 = vstv %s989_s0  ;;  %s1100_s0 = sld [smem:[#allocation7 + $0x284]]  ;;  %s1111_s4 = sld [smem:[#allocation8 + $0x3]] }
  0x62   :  { %v294_v54 = vadd.f32 %v293_v45, %v291_v40  ;;  %v296_v55 = vmul.f32 %v295_v17, %v993_v44  ;;  %v681_v57 = vpop.eup %680  ;;  %v1009_v58 = vmul.f32 %v252_v50, %v946_v6  ;;  %v324_v60 = vadd.f32 %v323_v46, %v321_v41  ;;  %s1119_s3 = sld [smem:[#allocation7 + $0x205]]  ;;  %s1146_s25 = sld [smem:[#allocation8 + $0x4]] }
  0x63   :  { %v299_v59 = vmul.f32 %v298_v31, %v998_v49  ;;  %v326_v61 = vmul.f32 %v325_v18, %v993_v44  ;;  %v683_v62 = vpop.eup %682  ;;  %v1018_v63 = vmul.f32 %v264_v53, %v948_v7  ;;  %v276_v0 = vadd.f32 1.0, %v681_v57  ;;  %s1152_s2 = sld [smem:[#allocation7 + $0x186]]  ;;  %s1154_s10 = sld [smem:[#allocation7 + $0x385]] }
  0x64   :  { %v297_v1 = vadd.f32 %v296_v55, %v294_v54  ;;  %v329_v2 = vmul.f32 %v328_v32, %v998_v49  ;;  %v288_v3 = vadd.f32 1.0, %v683_v62  ;;  %v302_v4 = vmul.f32 %v301_v37, %v1009_v58  ;;  %s1175_s26 = sld [smem:[#allocation8 + $0x5]] }
  0x65   :  { %v327_v5 = vadd.f32 %v326_v61, %v324_v60  ;;  %v332_v6 = vmul.f32 %v331_v42, %v1009_v58  ;;  %v1028_v8 = vmul.f32 %v276_v0, %v959_v13  ;;  %v305_v9 = vmul.f32 %v304_v56, %v1018_v63 }
  0x66   :  { %v300_v7 = vadd.f32 %v299_v59, %v297_v1  ;;  %v1035_v11 = vmul.f32 %v288_v3, %v961_v14  ;;  %v334_v15 = vstv %s984_s1  ;;  %v354_v21 = vadd.f32 %v353_v51, %v351_v47  ;;  %s1091_s1 = sld [smem:[#allocation7 + $0x106]] }
  0x67   :  { %v330_v12 = vadd.f32 %v329_v2, %v327_v5  ;;  %v308_v17 = vmul.f32 %v307_v10, %v1028_v8  ;;  %v335_v18 = vmul.f32 %v334_v15, %v1018_v63  ;;  %v338_v20 = vmul.f32 %v337_v16, %v1028_v8 }
  0x68   :  { %v303_v13 = vadd.f32 %v302_v4, %v300_v7  ;;  %v356_v25 = vmul.f32 %v355_v19, %v993_v44  ;;  %v359_v29 = vmul.f32 %v358_v38, %v998_v49  ;;  %v310_v32 = vstv %s1013_s20  ;;  %s1137_s20 = sld [smem:[#allocation7 + $0x305]] }
  0x69   :  { %v333_v14 = vadd.f32 %v332_v6, %v330_v12  ;;  %v340_v34 = vstv %s1015_s21  ;;  %v362_v36 = vmul.f32 %v361_v52, %v1009_v58  ;;  %v311_v19 = vmul.f32 %v310_v32, %v1035_v11  ;;  %s1161_s21 = sld [smem:[#allocation7 + $0x206]] }
  0x6a   :  { %v306_v31 = vadd.f32 %v305_v9, %v303_v13  ;;  %v341_v38 = vmul.f32 %v340_v34, %v1035_v11  ;;  %v357_v39 = vadd.f32 %v356_v25, %v354_v21  ;;  %v364_v41 = vstv %s1004_s18  ;;  %s1121_s18 = sld [smem:[#allocation7 + $0x384]] }
  0x6b   :  { %v336_v37 = vadd.f32 %v335_v18, %v333_v14  ;;  %v367_v42 = vstv %s1006_s19  ;;  %v381_v43 = vmul.f32 %v380_v22, %v975_v30  ;;  %v365_v47 = vmul.f32 %v364_v41, %v1018_v63  ;;  %s1125_s19 = sld [smem:[#allocation7 + $0x285]] }
  0x6c   :  { %v309_v40 = vadd.f32 %v308_v17, %v306_v31  ;;  %v360_v46 = vadd.f32 %v359_v29, %v357_v39  ;;  %v370_v48 = vstv %s1021_s22  ;;  %v313_v51 = vstv %s1039_s27  ;;  %s1166_s22 = sld [smem:[#allocation7 + $0x286]]  ;;  %s1190_s27 = sld [smem:[#allocation7 + $0x87]] }
  0x6d   :  { %v339_v45 = vadd.f32 %v338_v20, %v336_v37  ;;  %v343_v52 = vstv %s1041_s28  ;;  %v388_v53 = vstv %s1025_s23  ;;  %v368_v22 = vmul.f32 %v367_v42, %v1028_v8  ;;  %s1168_s23 = sld [smem:[#allocation7 + $0x306]] }
  0x6e   :  { %v312_v50 = vadd.f32 %v311_v19, %v309_v40  ;;  %v363_v55 = vadd.f32 %v362_v36, %v360_v46  ;;  %v383_v56 = vmul.f32 %v382_v23, %v980_v35  ;;  %v371_v59 = vmul.f32 %v370_v48, %v1035_v11  ;;  %s1192_s28 = sld [smem:[#allocation7 + $0x386]] }
  0x6f   :  { %v342_v54 = vadd.f32 %v341_v38, %v339_v45  ;;  %v386_v60 = vmul.f32 %v385_v24, %v993_v44  ;;  %v391_v61 = vstv %s1032_s24  ;;  %v389_v1 = vmul.f32 %v388_v53, %v998_v49  ;;  %s1186_s24 = sld [smem:[#allocation7 + $0x7]] }
  0x70   :  { %v1093_v57 = vadd.f32 %v313_v51, %v312_v50  ;;  %v366_v23 = vadd.f32 %v365_v47, %v363_v55  ;;  %v384_v0 = vadd.f32 %v383_v56, %v381_v43  ;;  %v394_v2 = vstv %s1056_s12  ;;  %s1212_s12 = sld [smem:[#allocation7 + $0x287]] }
  0x71   :  { %v1102_v62 = vadd.f32 %v343_v52, %v342_v54  ;;  %v418_v3 = vstv %s1054_s11  ;;  %v442_v4 = vstv %s1046_s30  ;;  %v445_v5 = vstv %s1048_s8  ;;  %s1197_s30 = sld [smem:[#allocation7 + $0x107]] }
  0x72   :  { %v369_v24 = vadd.f32 %v368_v22, %v366_v23  ;;  %v387_v6 = vadd.f32 %v386_v60, %v384_v0  ;;  %v392_v7 = vmul.f32 %v391_v61, %v1009_v58  ;;  %v448_v9 = vstv %s1063_s14  ;;  %s1203_s8 = sld [smem:[#allocation7 + $0x187]] }
  0x73   :  { %v316_v10 = vmul.f32 0.70710677, %v1093_v57  ;;  %v373_v12 = vstv %s1069_s15  ;;  %v397_v15 = vstv %s1067_s9  ;;  %v470_v16 = vstv %s1061_s13  ;;  %s1205_s11 = sld [smem:[#allocation7 + $0x207]]  ;;  %s1226_s9 = sld [smem:[#allocation8 + $0x6]] }
  0x74   :  { %v346_v13 = vmul.f32 0.70710677, %v1102_v62  ;;  %v372_v17 = vadd.f32 %v371_v59, %v369_v24  ;;  %v390_v18 = vadd.f32 %v389_v1, %v387_v6  ;;  %v395_v20 = vmul.f32 %v394_v2, %v1018_v63  ;;  %s1220_s13 = sld [smem:[#allocation7 + $0x307]]  ;;  %s1231_s15 = sld [smem:[#allocation10]] }
  0x75   :  { %v400_v14 = vstv %s1078_s16  ;;  %v411_v21 = vmul.f32 %v410_v26, %v975_v30  ;;  %v413_v25 = vmul.f32 %v412_v27, %v980_v35  ;;  %v416_v29 = vmul.f32 %v415_v28, %v993_v44  ;;  %s1224_s14 = sld [smem:[#allocation7 + $0x387]]  ;;  %s1233_s16 = sld [smem:[#allocation10 + $0x80]] }
  0x76   :  { %v1139_v31 = vadd.f32 %v373_v12, %v372_v17  ;;  %v393_v32 = vadd.f32 %v392_v7, %v390_v18  ;;  %v398_v34 = vmul.f32 %v397_v15, %v1028_v8  ;;  %v421_v36 = vstv %s1083_s17  ;;  %s1243_s17 = sld [smem:[#allocation10 + $0x100]] }
  0x77   :  { %v414_v19 = vadd.f32 %v413_v25, %v411_v21  ;;  %v419_v37 = vmul.f32 %v418_v3, %v998_v49  ;;  %v472_v26 = vstv %s1089_s5  ;;  %v475_v38 = vstv %s1091_s1  ;;  %s1250_s5 = sld [smem:[#allocation8 + $0x7]]  ;;  %s1256_s1 = sld [smem:[#allocation10 + $0x180]] }
  0x78   :  { %684 = verf.f32 %v316_v10  ;;  %v396_v27 = vadd.f32 %v395_v20, %v393_v32  ;;  %v401_v28 = vmul.f32 %v400_v14, %v1035_v11  ;;  %v424_v39 = vstv %s1100_s0  ;;  %s658_s0 = sld [smem:[#allocation10 + $0x200]] }
  0x79   :  { %686 = verf.f32 %v346_v13  ;;  %v417_v40 = vadd.f32 %v416_v29, %v414_v19  ;;  %v422_v41 = vmul.f32 %v421_v36, %v1009_v58  ;;  %v427_v42 = vstv %s1105_s29  ;;  %s659_s29 = sld [smem:[#allocation10 + $0x280]] }
  0x7a   :  { %v376_v43 = vmul.f32 0.70710677, %v1139_v31  ;;  %v399_v45 = vadd.f32 %v398_v34, %v396_v27  ;;  %v403_v46 = vstv %s1111_s4  ;;  %v441_v47 = vmul.f32 %v440_v33, %v975_v30  ;;  %s660_s4 = sld [smem:[#allocation10 + $0x300]] }
  0x7b   :  { %v420_v48 = vadd.f32 %v419_v37, %v417_v40  ;;  %v425_v50 = vmul.f32 %v424_v39, %v1018_v63  ;;  %v443_v51 = vmul.f32 %v442_v4, %v980_v35  ;;  %v446_v52 = vmul.f32 %v445_v5, %v993_v44 }
  0x7c   :  { %v402_v53 = vadd.f32 %v401_v28, %v399_v45  ;;  %v428_v54 = vmul.f32 %v427_v42, %v1028_v8  ;;  %v430_v55 = vstv %s1121_s18  ;;  %v451_v22 = vstv %s1119_s3  ;;  %s661_s3 = sld [smem:[#allocation10 + $0x380]] }
  0x7d   :  { %v423_v33 = vadd.f32 %v422_v41, %v420_v48  ;;  %v444_v56 = vadd.f32 %v443_v51, %v441_v47  ;;  %v449_v59 = vmul.f32 %v448_v9, %v998_v49  ;;  %v454_v60 = vstv %s1125_s19 }
  0x7e   :  { %v1178_v61 = vmul.f32 0.5, %v1093_v57  ;;  %v1181_v23 = vmul.f32 0.5, %v1102_v62  ;;  %v1183_v0 = vadd.f32 %v403_v46, %v402_v53  ;;  %v457_v1 = vstv %s1137_s20 }
  0x7f   :  { %v426_v2 = vadd.f32 %v425_v50, %v423_v33  ;;  %v431_v3 = vmul.f32 %v430_v55, %v1035_v11  ;;  %v447_v4 = vadd.f32 %v446_v52, %v444_v56  ;;  %v452_v5 = vmul.f32 %v451_v22, %v1009_v58 }
  0x80   :  { %688 = verf.f32 %v376_v43  ;;  %v406_v57 = vmul.f32 0.70710677, %v1183_v0  ;;  %v433_v62 = vstv %s1146_s25  ;;  %v455_v24 = vmul.f32 %v454_v60, %v1018_v63 }
  0x81   :  { %v429_v6 = vadd.f32 %v428_v54, %v426_v2  ;;  %v450_v7 = vadd.f32 %v449_v59, %v447_v4  ;;  %v458_v9 = vmul.f32 %v457_v1, %v1028_v8  ;;  %v471_v10 = vmul.f32 %v470_v16, %v975_v30 }
  0x82   :  { %v685_v12 = vpop.eup %684  ;;  %v460_v15 = vstv %s1154_s10  ;;  %v473_v13 = vmul.f32 %v472_v26, %v980_v35  ;;  %v476_v17 = vmul.f32 %v475_v38, %v993_v44  ;;  %v478_v18 = vstv %s1152_s2 }
  0x83   :  { %v687_v20 = vpop.eup %686  ;;  %690 = verf.f32 %v406_v57  ;;  %v432_v14 = vadd.f32 %v431_v3, %v429_v6  ;;  %v453_v21 = vadd.f32 %v452_v5, %v450_v7  ;;  %v481_v25 = vstv %s1161_s21 }
  0x84   :  { %v474_v16 = vadd.f32 %v473_v13, %v471_v10  ;;  %v479_v29 = vmul.f32 %v478_v18, %v998_v49  ;;  %v484_v32 = vstv %s1166_s22  ;;  %v487_v34 = vstv %s1168_s23 }
  0x85   :  { %v318_v36 = vadd.f32 1.0, %v685_v12  ;;  %v1217_v19 = vadd.f32 %v433_v62, %v432_v14  ;;  %v456_v37 = vadd.f32 %v455_v24, %v453_v21  ;;  %v461_v26 = vmul.f32 %v460_v15, %v1035_v11 }
  0x86   :  { %v348_v38 = vadd.f32 1.0, %v687_v20  ;;  %v463_v27 = vstv %s1175_s26  ;;  %v477_v28 = vadd.f32 %v476_v17, %v474_v16  ;;  %v482_v39 = vmul.f32 %v481_v25, %v1009_v58 }
  0x87   :  { %v436_v40 = vmul.f32 0.70710677, %v1217_v19  ;;  %v459_v41 = vadd.f32 %v458_v9, %v456_v37  ;;  %v485_v42 = vmul.f32 %v484_v32, %v1018_v63  ;;  %v488_v43 = vmul.f32 %v487_v34, %v1028_v8 }
  0x88   :  { %v480_v45 = vadd.f32 %v479_v29, %v477_v28  ;;  %v490_v46 = vstv %s1192_s28  ;;  %v500_v47 = vstv %s1186_s24  ;;  %v502_v48 = vstv %s1190_s27 }
  0x89   :  { %692 = verf.f32 %v436_v40  ;;  %v462_v50 = vadd.f32 %v461_v26, %v459_v41  ;;  %v501_v51 = vmul.f32 %v500_v47, %v975_v30  ;;  %v503_v52 = vmul.f32 %v502_v48, %v980_v35 }
  0x8a   :  { %v689_v53 = vpop.eup %688  ;;  %v483_v54 = vadd.f32 %v482_v39, %v480_v45  ;;  %v505_v55 = vstv %s1197_s30  ;;  %v508_v22 = vstv %s1203_s8  ;;  %v511_v33 = vstv %s1205_s11 }
  0x8b   :  { %v464_v56 = vadd.f32 %v463_v27, %v462_v50  ;;  %v504_v59 = vadd.f32 %v503_v52, %v501_v51  ;;  %v506_v60 = vmul.f32 %v505_v55, %v993_v44  ;;  %v509_v1 = vmul.f32 %v508_v22, %v998_v49 }
  0x8c   :  { %v375_v2 = vmul.f32 0.5, %v1139_v31  ;;  %v486_v30 = vadd.f32 %v485_v42, %v483_v54  ;;  %v491_v35 = vmul.f32 %v490_v46, %v1035_v11  ;;  %v514_v3 = vstv %s1212_s12 }
  0x8d   :  { %v691_v4 = vpop.eup %690  ;;  %v319_v5 = vmul.f32 %v318_v36, %v1178_v61  ;;  %v466_v57 = vmul.f32 0.70710677, %v464_v56  ;;  %v507_v62 = vadd.f32 %v506_v60, %v504_v59  ;;  %v512_v44 = vmul.f32 %v511_v33, %v1009_v58 }
  0x8e   :  { %v349_v49 = vmul.f32 %v348_v38, %v1181_v23  ;;  %v378_v31 = vadd.f32 1.0, %v689_v53  ;;  %v489_v24 = vadd.f32 %v488_v43, %v486_v30  ;;  %v517_v6 = vstv %s1220_s13 }
  0x8f   :  { %694 = verf.f32 %v466_v57  ;;  %v493_v7 = vstv %s1226_s9  ;;  %v510_v9 = vadd.f32 %v509_v1, %v507_v62  ;;  %v515_v10 = vmul.f32 %v514_v3, %v1018_v63 }
  0x90   :  { %v492_v12 = vadd.f32 %v491_v35, %v489_v24  ;;  %v520_v61 = vstv %s1224_s14  ;;  %v530_v15 = vstv %s1231_s15  ;;  %v532_v13 = vstv %s1233_s16 }
  0x91   :  { %v405_v17 = vmul.f32 0.5, %v1183_v0  ;;  %v408_v58 = vadd.f32 1.0, %v691_v4  ;;  %v513_v23 = vadd.f32 %v512_v44, %v510_v9  ;;  %v518_v18 = vmul.f32 %v517_v6, %v1028_v8 }
  0x92   :  { %v379_v20 = vmul.f32 %v378_v31, %v375_v2  ;;  %v494_v14 = vadd.f32 %v493_v7, %v492_v12  ;;  %v531_v21 = vmul.f32 %v530_v15, %v319_v5  ;;  %v533_v25 = vmul.f32 %v532_v13, %v349_v49 }
  0x93   :  { %v693_v16 = vpop.eup %692  ;;  %v516_v63 = vadd.f32 %v515_v10, %v513_v23  ;;  %v521_v29 = vmul.f32 %v520_v61, %v1035_v11  ;;  %v535_v32 = vstv %s1243_s17  ;;  %v409_v36 = vmul.f32 %v408_v58, %v405_v17 }
  0x94   :  { %v496_v34 = vmul.f32 0.70710677, %v494_v14  ;;  %v435_v0 = vmul.f32 0.5, %v1217_v19  ;;  %v523_v26 = vstv %s1250_s5  ;;  %v438_v38 = vadd.f32 1.0, %v693_v16 }
  0x95   :  { %v519_v37 = vadd.f32 %v518_v18, %v516_v63  ;;  %v534_v8 = vadd.f32 %v533_v25, %v531_v21  ;;  %v536_v27 = vmul.f32 %v535_v32, %v379_v20  ;;  %v538_v39 = vstv %s1256_s1 }
  0x96   :  { %696 = verf.f32 %v496_v34  ;;  %v465_v41 = vmul.f32 0.5, %v464_v56  ;;  %v439_v43 = vmul.f32 %v438_v38, %v435_v0  ;;  %v539_v46 = vmul.f32 %v538_v39, %v409_v36 }
  0x97   :  { %v522_v28 = vadd.f32 %v521_v29, %v519_v37  ;;  %v537_v11 = vadd.f32 %v536_v27, %v534_v8  ;;  %v541_v48 = vstv %s658_s0  ;;  %v495_v52 = vmul.f32 0.5, %v494_v14 }
  0x98   :  { %v542_v51 = vmul.f32 %v541_v48, %v439_v43  ;;  %v544_v53 = vstv %s659_s29  ;;  %v547_v59 = vstv %s660_s4  ;;  %v550_v3 = vstv %s661_s3 }
  0x99   :  { %v695_v40 = vpop.eup %694  ;;  %v524_v42 = vadd.f32 %v523_v26, %v522_v28  ;;  %v540_v50 = vadd.f32 %v539_v46, %v537_v11  ;;  %v553_v62 = vstv %s1282_s6 }
  0x9a   :  { %v468_v45 = vadd.f32 1.0, %v695_v40 }
  0x9b   :  { %v526_v47 = vmul.f32 0.70710677, %v524_v42  ;;  %v543_v22 = vadd.f32 %v542_v51, %v540_v50  ;;  %v525_v60 = vmul.f32 0.5, %v524_v42 }
  0x9c   :  { %v469_v19 = vmul.f32 %v468_v45, %v465_v41 }
  0x9d   :  { %698 = verf.f32 %v526_v47 }
  0x9e   :  { %v545_v33 = vmul.f32 %v544_v53, %v469_v19 }
  0xa0   :  { %v697_v54 = vpop.eup %696  ;;  %v546_v1 = vadd.f32 %v545_v33, %v543_v22 }
  0xa1   :  { %v498_v55 = vadd.f32 1.0, %v697_v54 }
  0xa3   :  { %v499_v56 = vmul.f32 %v498_v55, %v495_v52 }
  0xa5   :  { %v548_v2 = vmul.f32 %v547_v59, %v499_v56 }
  0xa7   :  { %v699_v30 = vpop.eup %698  ;;  %v549_v5 = vadd.f32 %v548_v2, %v546_v1 }
  0xa8   :  { %v528_v35 = vadd.f32 1.0, %v699_v30 }
  0xaa   :  { %v529_v4 = vmul.f32 %v528_v35, %v525_v60 }
  0xac   :  { %v551_v57 = vmul.f32 %v550_v3, %v529_v4 }
  0xae   :  { %v552_v44 = vadd.f32 %v551_v57, %v549_v5 }
  0xb0   :  { %v554_v49 = vadd.f32 %v553_v62, %v552_v44 }
  0xb2   :  { %555 = vst [vmem:[%s1283_s7] sm:$0xff] %v554_v49 }
  0xb3   :  { %560 = vsyncpa [#allocation4], 1 }
  0xb4   :  { %561 = vsyncpa [#allocation6], 1 }
  0xb5   :  { %562 = vsyncpa [#allocation9], 1 }

</bundles_post_ra>
